<compile_context>
chip_gen: v6e
topology: v6e:2x2x1
jax: 0.10.0
libtpu: 0.0.40
codegen_flags: <defaults>
</compile_context>

<pallas_src>
import jax
import jax.numpy as jnp
from jax.experimental import pallas as pl
from jax.experimental.pallas import tpu as pltpu


# ----- exact GELU via Abramowitz & Stegun 7.1.26 erf polynomial ---------------
_ERF_A1 = 0.254829592
_ERF_A2 = -0.284496736
_ERF_A3 = 1.421413741
_ERF_A4 = -1.453152027
_ERF_A5 = 1.061405429
_ERF_P = 0.3275911
_INV_SQRT2 = 0.7071067811865476


def _erf_approx(z):
    sign = jnp.where(z >= 0, jnp.float32(1.0), jnp.float32(-1.0))
    za = jnp.abs(z)
    # EUP reciprocal (next to the EUP exp below) instead of a multi-op f32 divide.
    t = pl.reciprocal(1.0 + _ERF_P * za, approx=False)
    poly = ((((_ERF_A5 * t + _ERF_A4) * t + _ERF_A3) * t + _ERF_A2) * t + _ERF_A1) * t
    return sign * (1.0 - poly * jnp.exp(-za * za))


def _gelu_exact(x):
    # PyTorch nn.GELU() default (approximate='none'): 0.5*x*(1 + erf(x/sqrt(2)))
    return 0.5 * x * (1.0 + _erf_approx(x * _INV_SQRT2))


# ----- fused kernel -----------------------------------------------------------
def ewp_kernel(x_ref, p_ref, wlt_ref, out1_ref, out2_ref):
    # x_ref   : (TB, 1, L)  batch block, lane axis = L
    # p_ref   : (2C, PW)    packed params:
    #             rows 0..C-1 : col 0 = w1, col 1 = b1, cols 2..2+C = w2 (o on sublanes)
    #             rows C..2C-1: cols 0..L = b2 (x) colsum(W.T) + b_lin
    # wlt_ref : (L, L)      linear2 weight pre-transposed (out = y @ W.T)
    tb, _, L = x_ref.shape
    C = out1_ref.shape[1]

    w1 = p_ref[0:C, 0:1][None, :, :]                      # (1, C, 1)
    b1 = p_ref[0:C, 1:2][None, :, :]                      # (1, C, 1)

    # conv1 (1x1 Conv1d(1->C)) + exact GELU  ->  (TB, C, L)
    h = _gelu_exact(w1 * x_ref[...] + b1)

    # The single big MXU matmul per step: hW = h @ W.T with M = TB*C.
    hW = jnp.dot(h.reshape(tb * C, L), wlt_ref[...],
                 preferred_element_type=jnp.float32).reshape(tb, C, L)

    # conv2 channel mix applied in the transformed space:
    #   x_in @ W.T = W2 @ hW + b2 (x) colsum(W.T)
    # done as C broadcast-FMAs on the VPU (no TB tiny 8x8 MXU matmuls).
    mix = hW[:, 0:1, :] * p_ref[0:C, 2:3][None, :, :]
    for c in range(1, C):
        mix = mix + hW[:, c:c + 1, :] * p_ref[0:C, 2 + c:3 + c][None, :, :]

    bias2 = p_ref[C:2 * C, 0:L][None, :, :]               # (1, C, L)
    out2 = mix + bias2                                     # linear2(x_in)
    out2_ref[...] = out2
    out1_ref[...] = hW + out2                              # linear2(h + x_in)


# ----- block-size heuristic ----------------------------------------------------
def _choose_block_b(B, C):
    # Target M = TB*C ~ 256 (fills the v6e/v7x MXU), but keep >= 2 grid steps when
    # the batch allows (v7x has 2 TensorCores) without dropping M below 128 (v5e MXU).
    tb = max(1, min(B, max(1, 256 // max(C, 1))))
    while tb > 1 and -(-B // tb) < 2 and tb * C > 128:
        tb = max(1, tb // 2)
    return tb


# ----- wrapper ----------------------------------------------------------------
def elementwise_product_layer(x, conv1_w, conv1_b, conv2_w, conv2_b, lin_w, lin_b,
                              *, block_b=None):
    """Pallas equivalent of ElementWiseProductLayer.forward(x).

    x       : (B, 1, L) float32
    conv1_w : (C, 1, 1), conv1_b : (C,)
    conv2_w : (C, C, 1), conv2_b : (C,)
    lin_w   : (L, L),    lin_b   : (L,)
    Returns (out1, out2), each (B, C, L) float32.
    """
    f32 = jnp.float32
    B, _, L = x.shape
    C = conv1_w.shape[0]

    x = x.astype(f32)
    w1 = conv1_w.reshape(C).astype(f32)
    b1 = conv1_b.reshape(C).astype(f32)
    w2 = conv2_w.reshape(C, C).astype(f32)
    b2 = conv2_b.reshape(C).astype(f32)
    lin_w = lin_w.astype(f32)
    lin_b = lin_b.astype(f32)

    wlt = jnp.transpose(lin_w)                     # (L, L): linear is y @ W.T + b
    colsum = jnp.sum(wlt, axis=0)                  # ones(L) @ W.T
    bias2 = b2[:, None] * colsum[None, :] + lin_b[None, :]   # (C, L)

    # Pack all small parameters into a single lane-dense array (one DMA stream).
    PW = max(L, C + 2)
    packed = jnp.zeros((2 * C, PW), f32)
    packed = packed.at[0:C, 0].set(w1)
    packed = packed.at[0:C, 1].set(b1)
    packed = packed.at[0:C, 2:2 + C].set(w2)
    packed = packed.at[C:2 * C, 0:L].set(bias2)

    tb = _choose_block_b(B, C) if block_b is None else block_b
    n_blocks = -(-B // tb)
    Bp = n_blocks * tb
    if Bp != B:
        x = jnp.concatenate([x, jnp.zeros((Bp - B, 1, L), f32)], axis=0)

    out1, out2 = pl.pallas_call(
        ewp_kernel,
        out_shape=(
            jax.ShapeDtypeStruct((Bp, C, L), f32),
            jax.ShapeDtypeStruct((Bp, C, L), f32),
        ),
        grid_spec=pltpu.PrefetchScalarGridSpec(
            num_scalar_prefetch=0,
            grid=(n_blocks,),
            in_specs=[
                pl.BlockSpec((tb, 1, L), lambda i: (i, 0, 0)),     # x batch block
                pl.BlockSpec((2 * C, PW), lambda i: (0, 0)),       # packed small params
                pl.BlockSpec((L, L), lambda i: (0, 0)),            # linear2 weight^T
            ],
            out_specs=(
                pl.BlockSpec((tb, C, L), lambda i: (i, 0, 0)),     # out1
                pl.BlockSpec((tb, C, L), lambda i: (i, 0, 0)),     # out2
            ),
        ),
        compiler_params=pltpu.CompilerParams(
            dimension_semantics=("parallel",)),
    )(x, packed, wlt)

    if Bp != B:
        out1 = out1[:B]
        out2 = out2[:B]
    return out1, out2


# ----- pure-JAX reference (transcription of the PyTorch forward) ---------------
def reference(x, conv1_w, conv1_b, conv2_w, conv2_b, lin_w, lin_b):
    C = conv1_w.shape[0]
    hi = jax.lax.Precision.HIGHEST
    w1 = conv1_w.reshape(C)
    w2 = conv2_w.reshape(C, C)
    h = w1[None, :, None] * x + conv1_b[None, :, None]                 # conv1 (1x1)
    h = jax.nn.gelu(h, approximate=False)                              # exact GELU
    x_in = jnp.einsum("oc,bcl->bol", w2, h, precision=hi) + conv2_b[None, :, None]
    y = h + x_in
    out1 = jnp.einsum("bcl,ml->bcm", y, lin_w, precision=hi) + lin_b[None, None, :]
    out2 = jnp.einsum("bcl,ml->bcm", x_in, lin_w, precision=hi) + lin_b[None, None, :]
    # NOTE: dropout is defined on the module but never invoked in forward();
    # torch.no_grad() only disables autograd and does not change forward values.
    return out1, out2


if __name__ == "__main__":
    # batch=32, out_channel=8, input_size=128 (lane-aligned); block_b heuristic
    # picks TB=16 -> 2 "parallel" grid steps, big-matmul M = 128 per step.
    B, C, L = 32, 8, 128
    rng = jax.random.PRNGKey(0)
    ks = jax.random.split(rng, 7)

    x = jax.random.normal(ks[0], (B, 1, L), jnp.float32)
    conv1_w = jax.random.normal(ks[1], (C, 1, 1), jnp.float32) * 0.5
    conv1_b = jax.random.normal(ks[2], (C,), jnp.float32) * 0.1
    conv2_w = jax.random.normal(ks[3], (C, C, 1), jnp.float32) * (1.0 / jnp.sqrt(C))
    conv2_b = jax.random.normal(ks[4], (C,), jnp.float32) * 0.1
    lin_w = jax.random.normal(ks[5], (L, L), jnp.float32) * (1.0 / jnp.sqrt(L))
    lin_b = jax.random.normal(ks[6], (L,), jnp.float32) * 0.1

    out1, out2 = elementwise_product_layer(
        x, conv1_w, conv1_b, conv2_w, conv2_b, lin_w, lin_b)
    jax.block_until_ready((out1, out2))

    ref1, ref2 = reference(x, conv1_w, conv1_b, conv2_w, conv2_b, lin_w, lin_b)
    assert out1.shape == (B, C, L) and out2.shape == (B, C, L)
    assert jnp.allclose(out1, ref1, rtol=2e-4, atol=2e-4), float(
        jnp.max(jnp.abs(out1 - ref1)))
    assert jnp.allclose(out2, ref2, rtol=2e-4, atol=2e-4), float(
        jnp.max(jnp.abs(out2 - ref2)))

    print("KERNEL_OK")
</pallas_src>

<mosaic_0001>
module attributes {stable_mosaic.version = 11 : i64} {
  func.func @ewp_kernel(%arg0: i32, %arg1: memref<16x1x128xf32, #tpu.memory_space<vmem>>, %arg2: memref<16x128xf32, #tpu.memory_space<vmem>>, %arg3: memref<128x128xf32, #tpu.memory_space<vmem>>, %arg4: memref<16x8x128xf32, #tpu.memory_space<vmem>>, %arg5: memref<16x8x128xf32, #tpu.memory_space<vmem>>) attributes {dimension_semantics = [#tpu.dimension_semantics<parallel>], iteration_bounds = array<i64: 2>, scalar_prefetch = 0 : i64, scratch_operands = 0 : i64, tpu.core_type = #tpu.core_type<tc>, window_params = [{transform_indices = @transform_0, window_bounds = array<i64: 16, 1, 128>}, {pipeline_mode = #tpu.pipeline_mode<synchronous>, transform_indices = @transform_1, window_bounds = array<i64: 16, 128>}, {pipeline_mode = #tpu.pipeline_mode<synchronous>, transform_indices = @transform_2, window_bounds = array<i64: 128, 128>}, {transform_indices = @transform_3, window_bounds = array<i64: 16, 8, 128>}, {transform_indices = @transform_4, window_bounds = array<i64: 16, 8, 128>}]} {
    %c0 = arith.constant 0 : index
    %c0_0 = arith.constant 0 : index
    %0 = vector.load %arg2[%c0, %c0_0] : memref<16x128xf32, #tpu.memory_space<vmem>>, vector<8x1xf32>
    %1 = vector.shape_cast %0 : vector<8x1xf32> to vector<1x8x1xf32>
    %c0_1 = arith.constant 0 : index
    %c1 = arith.constant 1 : index
    %2 = vector.load %arg2[%c0_1, %c1] : memref<16x128xf32, #tpu.memory_space<vmem>>, vector<8x1xf32>
    %3 = vector.shape_cast %2 : vector<8x1xf32> to vector<1x8x1xf32>
    %c0_2 = arith.constant 0 : index
    %c0_3 = arith.constant 0 : index
    %c0_4 = arith.constant 0 : index
    %4 = vector.load %arg1[%c0_2, %c0_3, %c0_4] : memref<16x1x128xf32, #tpu.memory_space<vmem>>, vector<16x1x128xf32>
    %5 = vector.broadcast %1 : vector<1x8x1xf32> to vector<16x8x128xf32>
    %6 = vector.broadcast %4 : vector<16x1x128xf32> to vector<16x8x128xf32>
    %7 = arith.mulf %5, %6 : vector<16x8x128xf32>
    %8 = vector.broadcast %3 : vector<1x8x1xf32> to vector<16x8x128xf32>
    %9 = arith.addf %7, %8 : vector<16x8x128xf32>
    %cst = arith.constant 5.000000e-01 : f32
    %10 = vector.broadcast %cst : f32 to vector<16x8x128xf32>
    %11 = arith.mulf %10, %9 : vector<16x8x128xf32>
    %cst_5 = arith.constant 0.707106769 : f32
    %12 = vector.broadcast %cst_5 : f32 to vector<16x8x128xf32>
    %13 = arith.mulf %9, %12 : vector<16x8x128xf32>
    %cst_6 = arith.constant 0.000000e+00 : f32
    %14 = vector.broadcast %cst_6 : f32 to vector<16x8x128xf32>
    %15 = arith.cmpf oge, %13, %14 : vector<16x8x128xf32>
    %cst_7 = arith.constant 1.000000e+00 : f32
    %cst_8 = arith.constant -1.000000e+00 : f32
    %16 = vector.broadcast %cst_7 : f32 to vector<16x8x128xf32>
    %17 = vector.broadcast %cst_8 : f32 to vector<16x8x128xf32>
    %18 = arith.select %15, %16, %17 : vector<16x8x128xi1>, vector<16x8x128xf32>
    %19 = math.absf %13 : vector<16x8x128xf32>
    %cst_9 = arith.constant 0.327591091 : f32
    %20 = vector.broadcast %cst_9 : f32 to vector<16x8x128xf32>
    %21 = arith.mulf %20, %19 : vector<16x8x128xf32>
    %cst_10 = arith.constant 1.000000e+00 : f32
    %22 = vector.broadcast %cst_10 : f32 to vector<16x8x128xf32>
    %23 = arith.addf %22, %21 : vector<16x8x128xf32>
    %24 = tpu.reciprocal %23 : vector<16x8x128xf32> -> vector<16x8x128xf32>
    %cst_11 = arith.constant 1.06140542 : f32
    %25 = vector.broadcast %cst_11 : f32 to vector<16x8x128xf32>
    %26 = arith.mulf %25, %24 : vector<16x8x128xf32>
    %cst_12 = arith.constant -1.45315206 : f32
    %27 = vector.broadcast %cst_12 : f32 to vector<16x8x128xf32>
    %28 = arith.addf %26, %27 : vector<16x8x128xf32>
    %29 = arith.mulf %28, %24 : vector<16x8x128xf32>
    %cst_13 = arith.constant 1.42141378 : f32
    %30 = vector.broadcast %cst_13 : f32 to vector<16x8x128xf32>
    %31 = arith.addf %29, %30 : vector<16x8x128xf32>
    %32 = arith.mulf %31, %24 : vector<16x8x128xf32>
    %cst_14 = arith.constant -0.284496725 : f32
    %33 = vector.broadcast %cst_14 : f32 to vector<16x8x128xf32>
    %34 = arith.addf %32, %33 : vector<16x8x128xf32>
    %35 = arith.mulf %34, %24 : vector<16x8x128xf32>
    %cst_15 = arith.constant 0.254829586 : f32
    %36 = vector.broadcast %cst_15 : f32 to vector<16x8x128xf32>
    %37 = arith.addf %35, %36 : vector<16x8x128xf32>
    %38 = arith.mulf %37, %24 : vector<16x8x128xf32>
    %cst_16 = arith.constant 0.000000e+00 : f32
    %39 = vector.broadcast %cst_16 : f32 to vector<16x8x128xf32>
    %40 = arith.subf %39, %19 : vector<16x8x128xf32>
    %41 = arith.mulf %40, %19 : vector<16x8x128xf32>
    %42 = math.exp %41 : vector<16x8x128xf32>
    %43 = arith.mulf %38, %42 : vector<16x8x128xf32>
    %cst_17 = arith.constant 1.000000e+00 : f32
    %44 = vector.broadcast %cst_17 : f32 to vector<16x8x128xf32>
    %45 = arith.subf %44, %43 : vector<16x8x128xf32>
    %46 = arith.mulf %18, %45 : vector<16x8x128xf32>
    %cst_18 = arith.constant 1.000000e+00 : f32
    %47 = vector.broadcast %cst_18 : f32 to vector<16x8x128xf32>
    %48 = arith.addf %47, %46 : vector<16x8x128xf32>
    %49 = arith.mulf %11, %48 : vector<16x8x128xf32>
    %50 = vector.shape_cast %49 : vector<16x8x128xf32> to vector<128x128xf32>
    %c0_19 = arith.constant 0 : index
    %c0_20 = arith.constant 0 : index
    %51 = vector.load %arg3[%c0_19, %c0_20] : memref<128x128xf32, #tpu.memory_space<vmem>>, vector<128x128xf32>
    %cst_21 = arith.constant dense<0.000000e+00> : vector<128x128xf32>
    %52 = tpu.matmul %50, %51, %cst_21 {dimension_numbers = #tpu.dot_dimension_numbers<[1], [0], [0], [1], [0, 0, 1, 1], [], []>} : vector<128x128xf32>, vector<128x128xf32>, vector<128x128xf32> -> vector<128x128xf32>
    %53 = vector.shape_cast %52 : vector<128x128xf32> to vector<16x8x128xf32>
    %54 = vector.extract_strided_slice %53 {offsets = [0, 0, 0], sizes = [16, 1, 128], strides = [1, 1, 1]} : vector<16x8x128xf32> to vector<16x1x128xf32>
    %c0_22 = arith.constant 0 : index
    %c2 = arith.constant 2 : index
    %55 = vector.load %arg2[%c0_22, %c2] : memref<16x128xf32, #tpu.memory_space<vmem>>, vector<8x1xf32>
    %56 = vector.shape_cast %55 : vector<8x1xf32> to vector<1x8x1xf32>
    %57 = vector.broadcast %54 : vector<16x1x128xf32> to vector<16x8x128xf32>
    %58 = vector.broadcast %56 : vector<1x8x1xf32> to vector<16x8x128xf32>
    %59 = arith.mulf %57, %58 : vector<16x8x128xf32>
    %60 = vector.extract_strided_slice %53 {offsets = [0, 1, 0], sizes = [16, 1, 128], strides = [1, 1, 1]} : vector<16x8x128xf32> to vector<16x1x128xf32>
    %c0_23 = arith.constant 0 : index
    %c3 = arith.constant 3 : index
    %61 = vector.load %arg2[%c0_23, %c3] : memref<16x128xf32, #tpu.memory_space<vmem>>, vector<8x1xf32>
    %62 = vector.shape_cast %61 : vector<8x1xf32> to vector<1x8x1xf32>
    %63 = vector.broadcast %60 : vector<16x1x128xf32> to vector<16x8x128xf32>
    %64 = vector.broadcast %62 : vector<1x8x1xf32> to vector<16x8x128xf32>
    %65 = arith.mulf %63, %64 : vector<16x8x128xf32>
    %66 = arith.addf %59, %65 : vector<16x8x128xf32>
    %67 = vector.extract_strided_slice %53 {offsets = [0, 2, 0], sizes = [16, 1, 128], strides = [1, 1, 1]} : vector<16x8x128xf32> to vector<16x1x128xf32>
    %c0_24 = arith.constant 0 : index
    %c4 = arith.constant 4 : index
    %68 = vector.load %arg2[%c0_24, %c4] : memref<16x128xf32, #tpu.memory_space<vmem>>, vector<8x1xf32>
    %69 = vector.shape_cast %68 : vector<8x1xf32> to vector<1x8x1xf32>
    %70 = vector.broadcast %67 : vector<16x1x128xf32> to vector<16x8x128xf32>
    %71 = vector.broadcast %69 : vector<1x8x1xf32> to vector<16x8x128xf32>
    %72 = arith.mulf %70, %71 : vector<16x8x128xf32>
    %73 = arith.addf %66, %72 : vector<16x8x128xf32>
    %74 = vector.extract_strided_slice %53 {offsets = [0, 3, 0], sizes = [16, 1, 128], strides = [1, 1, 1]} : vector<16x8x128xf32> to vector<16x1x128xf32>
    %c0_25 = arith.constant 0 : index
    %c5 = arith.constant 5 : index
    %75 = vector.load %arg2[%c0_25, %c5] : memref<16x128xf32, #tpu.memory_space<vmem>>, vector<8x1xf32>
    %76 = vector.shape_cast %75 : vector<8x1xf32> to vector<1x8x1xf32>
    %77 = vector.broadcast %74 : vector<16x1x128xf32> to vector<16x8x128xf32>
    %78 = vector.broadcast %76 : vector<1x8x1xf32> to vector<16x8x128xf32>
    %79 = arith.mulf %77, %78 : vector<16x8x128xf32>
    %80 = arith.addf %73, %79 : vector<16x8x128xf32>
    %81 = vector.extract_strided_slice %53 {offsets = [0, 4, 0], sizes = [16, 1, 128], strides = [1, 1, 1]} : vector<16x8x128xf32> to vector<16x1x128xf32>
    %c0_26 = arith.constant 0 : index
    %c6 = arith.constant 6 : index
    %82 = vector.load %arg2[%c0_26, %c6] : memref<16x128xf32, #tpu.memory_space<vmem>>, vector<8x1xf32>
    %83 = vector.shape_cast %82 : vector<8x1xf32> to vector<1x8x1xf32>
    %84 = vector.broadcast %81 : vector<16x1x128xf32> to vector<16x8x128xf32>
    %85 = vector.broadcast %83 : vector<1x8x1xf32> to vector<16x8x128xf32>
    %86 = arith.mulf %84, %85 : vector<16x8x128xf32>
    %87 = arith.addf %80, %86 : vector<16x8x128xf32>
    %88 = vector.extract_strided_slice %53 {offsets = [0, 5, 0], sizes = [16, 1, 128], strides = [1, 1, 1]} : vector<16x8x128xf32> to vector<16x1x128xf32>
    %c0_27 = arith.constant 0 : index
    %c7 = arith.constant 7 : index
    %89 = vector.load %arg2[%c0_27, %c7] : memref<16x128xf32, #tpu.memory_space<vmem>>, vector<8x1xf32>
    %90 = vector.shape_cast %89 : vector<8x1xf32> to vector<1x8x1xf32>
    %91 = vector.broadcast %88 : vector<16x1x128xf32> to vector<16x8x128xf32>
    %92 = vector.broadcast %90 : vector<1x8x1xf32> to vector<16x8x128xf32>
    %93 = arith.mulf %91, %92 : vector<16x8x128xf32>
    %94 = arith.addf %87, %93 : vector<16x8x128xf32>
    %95 = vector.extract_strided_slice %53 {offsets = [0, 6, 0], sizes = [16, 1, 128], strides = [1, 1, 1]} : vector<16x8x128xf32> to vector<16x1x128xf32>
    %c0_28 = arith.constant 0 : index
    %c8 = arith.constant 8 : index
    %96 = vector.load %arg2[%c0_28, %c8] : memref<16x128xf32, #tpu.memory_space<vmem>>, vector<8x1xf32>
    %97 = vector.shape_cast %96 : vector<8x1xf32> to vector<1x8x1xf32>
    %98 = vector.broadcast %95 : vector<16x1x128xf32> to vector<16x8x128xf32>
    %99 = vector.broadcast %97 : vector<1x8x1xf32> to vector<16x8x128xf32>
    %100 = arith.mulf %98, %99 : vector<16x8x128xf32>
    %101 = arith.addf %94, %100 : vector<16x8x128xf32>
    %102 = vector.extract_strided_slice %53 {offsets = [0, 7, 0], sizes = [16, 1, 128], strides = [1, 1, 1]} : vector<16x8x128xf32> to vector<16x1x128xf32>
    %c0_29 = arith.constant 0 : index
    %c9 = arith.constant 9 : index
    %103 = vector.load %arg2[%c0_29, %c9] : memref<16x128xf32, #tpu.memory_space<vmem>>, vector<8x1xf32>
    %104 = vector.shape_cast %103 : vector<8x1xf32> to vector<1x8x1xf32>
    %105 = vector.broadcast %102 : vector<16x1x128xf32> to vector<16x8x128xf32>
    %106 = vector.broadcast %104 : vector<1x8x1xf32> to vector<16x8x128xf32>
    %107 = arith.mulf %105, %106 : vector<16x8x128xf32>
    %108 = arith.addf %101, %107 : vector<16x8x128xf32>
    %c8_30 = arith.constant 8 : index
    %c0_31 = arith.constant 0 : index
    %109 = vector.load %arg2[%c8_30, %c0_31] : memref<16x128xf32, #tpu.memory_space<vmem>>, vector<8x128xf32>
    %110 = vector.shape_cast %109 : vector<8x128xf32> to vector<1x8x128xf32>
    %111 = vector.broadcast %110 : vector<1x8x128xf32> to vector<16x8x128xf32>
    %112 = arith.addf %108, %111 : vector<16x8x128xf32>
    %c0_32 = arith.constant 0 : index
    %c0_33 = arith.constant 0 : index
    %c0_34 = arith.constant 0 : index
    %113 = vector.load %arg5[%c0_32, %c0_33, %c0_34] : memref<16x8x128xf32, #tpu.memory_space<vmem>>, vector<16x8x128xf32>
    tpu.vector_store %arg5[%c0_32, %c0_33, %c0_34], %112 {strides = array<i32>} : memref<16x8x128xf32, #tpu.memory_space<vmem>>, vector<16x8x128xf32>,
    %114 = arith.addf %53, %112 : vector<16x8x128xf32>
    %c0_35 = arith.constant 0 : index
    %c0_36 = arith.constant 0 : index
    %c0_37 = arith.constant 0 : index
    %115 = vector.load %arg4[%c0_35, %c0_36, %c0_37] : memref<16x8x128xf32, #tpu.memory_space<vmem>>, vector<16x8x128xf32>
    tpu.vector_store %arg4[%c0_35, %c0_36, %c0_37], %114 {strides = array<i32>} : memref<16x8x128xf32, #tpu.memory_space<vmem>>, vector<16x8x128xf32>,
    return
  }
  func.func @transform_0(%arg0: i32) -> (i32, i32, i32) {
    %c0_i32 = arith.constant 0 : i32
    %c0_i32_0 = arith.constant 0 : i32
    %c0_i32_1 = arith.constant 0 : i32
    return %arg0, %c0_i32, %c0_i32_0 : i32, i32, i32
  }
  func.func @transform_1(%arg0: i32) -> (i32, i32) {
    %c0_i32 = arith.constant 0 : i32
    %c0_i32_0 = arith.constant 0 : i32
    %c0_i32_1 = arith.constant 0 : i32
    return %c0_i32, %c0_i32_0 : i32, i32
  }
  func.func @transform_2(%arg0: i32) -> (i32, i32) {
    %c0_i32 = arith.constant 0 : i32
    %c0_i32_0 = arith.constant 0 : i32
    %c0_i32_1 = arith.constant 0 : i32
    return %c0_i32, %c0_i32_0 : i32, i32
  }
  func.func @transform_3(%arg0: i32) -> (i32, i32, i32) {
    %c0_i32 = arith.constant 0 : i32
    %c0_i32_0 = arith.constant 0 : i32
    %c0_i32_1 = arith.constant 0 : i32
    return %arg0, %c0_i32, %c0_i32_0 : i32, i32, i32
  }
  func.func @transform_4(%arg0: i32) -> (i32, i32, i32) {
    %c0_i32 = arith.constant 0 : i32
    %c0_i32_0 = arith.constant 0 : i32
    %c0_i32_1 = arith.constant 0 : i32
    return %arg0, %c0_i32, %c0_i32_0 : i32, i32, i32
  }
}

</mosaic_0001>

<bundles_post_ra>
// kernel: tpu_custom_call.1
= control target key start
LH: loop header
LB: loop body
LE: loop exit
PB: predicated region body
PF: predicated region fallthrough
CT: control target
= control target key end

     0   :  { %10 = vsyncpa [#allocation3], 0  ;;  %s3673_s0 = inlined_call_operand.hbm [shape: f32[32,1,128], index: 0, kind: input, shape index: {}]   ;;  %s3674_s1 = inlined_call_operand.hbm [shape: f32[16,128], index: 1, kind: input, shape index: {}]   ;;  %s3675_s2 = inlined_call_operand.hbm [shape: f32[128,128], index: 2, kind: input, shape index: {}]   ;;  %s3676_s3 = inlined_call_operand.hbm [shape: f32[32,8,128], index: 3, kind: output, shape index: {0}]   ;;  %s3677_s4 = inlined_call_operand.hbm [shape: f32[32,8,128], index: 4, kind: output, shape index: {1}]  }
   0x1   :  { %12 = vsyncpa [#allocation3 + $0x1], 0 }
   0x2   :  { %13 = vsyncpa [#allocation6], 0 }
   0x3   :  { %14 = vsyncpa [#allocation4], 0 }
   0x4   :  { %16 = vsyncpa [#allocation4 + $0x1], 0 }
   0x5   :  { %17 = vsyncpa [#allocation10], 0 }
   0x6   :  { %19 = vsyncpa [#allocation10 + $0x1], 0  ;;  %s2551_s15 = smov 0   ;;  %s2553_s16 = smov 0  }
   0x7   :  { %s2555_s17 = smov 0   ;;  %s2557_s18 = smov 0  }
   0x8 LB: > { %s2572_s19 = sadd.s32 4294967295, %s2502_s18   ;;  %s1998_s20 = sadd.s32 4294967294, %s2502_s18   ;;  %s2502_s18 = sphi %s2557_s18, %s3699_s18   ;;  %s2498_s17 = sphi %s2555_s17, %s3698_s17   ;;  %s2494_s16 = sphi %s2553_s16, %s3697_s16   ;;  %s2490_s15 = sphi %s2551_s15, %s3696_s15  }
   0x9   : > { %p45_p0 = scmp.ne.s32.totalorder %s2494_s16, %s2490_s15  ;;  %p3678_p1 = scmp.eq.s32.totalorder %s2572_s19, 0 }
   0xa   : > { %p117_p3 = scmp.eq.s32.totalorder %s1998_s20, 1  ;;  %p1999_p5 = scmp.ge.s32.totalorder %s2502_s18, 1 }
   0xb   : > { %p2581_p4 = por %p3678_p1, %p45_p0  ;;  %p150_p7 = scmp.lt.s32.totalorder %s2502_s18, 3 }
   0xc   : > { %p2586_p6 = por %p117_p3, %p45_p0  ;;  %s2504_s24 = smov [#allocation5]  }
   0xd   : > { %s3682_s21 = scalar_select %p2581_p4, 1, 0 }
   0xe   : > { %s3683_s22 = scalar_select %p2586_p6, 1, 0 }
   0xf   : > { %p2591_p8 = pnand %p1999_p5, %p150_p7  ;;  %s162_s25 = sshll.u32 %s2504_s24, 4  ;;  %s163_s25 = int_to_ptr.vmem [resolvable:$true] %s162_s25 }
  0x10   : > { %s2505_s27 = smov [#allocation7]   ;;  %s2335_s29 = scalar_lea.vmem %s163_s25, 256 }
  0x11   : > { %s3684_s23 = scalar_select %p2591_p8, 1, 0 }
  0x12   : > { %p2173_p9 = pneg %p2591_p8  ;;  %s175_s28 = sshll.u32 %s2505_s27, 4  ;;  %s176_s28 = int_to_ptr.vmem [resolvable:$true] %s175_s28 }
  0x13   : > { %p2336_p13 = scmp.ne.s32.totalorder %s163_s25, %s2335_s29  ;;  %p2343_p5 = scmp.lt.s32.totalorder %s163_s25, %s163_s25 }
  0x14   : > { %p2600_p11 = pnand %p2173_p9, %p3678_p1  ;;  %p2344_p7 = scmp.lt.s32.totalorder %s2335_s29, %s2335_s29 }
  0x16   : > { %p2326_p12 = pneg %p2600_p11  ;;  %p2345_p10 = por %p2344_p7, %p2343_p5 }
  0x18   : > { %p2338_p0 = pnand %p2336_p13, %p2326_p12 }
  0x1a   : > { %p2339_p3 = pneg %p2338_p0 }
  0x1c   : > { %p2346_p9 = pnand %p2345_p10, %p2339_p3 }
  0x1e   : > { %2349 = shalt.err (!%p2346_p9)
}
  0x1f   : > { %s2506_s30 = smov 128   ;;  %s2507_s5 = smov 8  }
  0x20   : > { %2176 = dma.hbm_to_vmem [thread:$0]  (!%p2600_p11), %s3674_s1, 256, %s163_s25, [#allocation6], %s2506_s30, %s2506_s30, %s2507_s5  }
  0x21   : > { %s2361_s8 = scalar_lea.vmem %s176_s28, 2048  ;;  %p2369_p2 = scmp.lt.s32.totalorder %s176_s28, %s176_s28 }
  0x22   : > { %p2362_p1 = scmp.ne.s32.totalorder %s176_s28, %s2361_s8  ;;  %p2370_p6 = scmp.lt.s32.totalorder %s2361_s8, %s2361_s8 }
  0x24   : > { %p2364_p13 = pnand %p2362_p1, %p2326_p12  ;;  %p2371_p5 = por %p2370_p6, %p2369_p2 }
  0x26   : > { %p2365_p0 = pneg %p2364_p13 }
  0x28   : > { %p2372_p10 = pnand %p2371_p5, %p2365_p0 }
  0x2a   : > { %2375 = shalt.err (!%p2372_p10)
}
  0x2b   : > { %2179 = dma.hbm_to_vmem [thread:$0]  (!%p2600_p11), %s3675_s2, 2048, %s176_s28, [#allocation6], %s2506_s30, %s2506_s30, %s2507_s5  }
  0x2c   : > { %s2623_s11 = sadd.s32 1, %s2502_s18   ;;  %s32_s12 = sadd.s32 1, %s2498_s17 }
  0x2d   : > { %s29_s13 = ssub.s32 %s2502_s18, %s2623_s11  ;;  %p39_p1 = scmp.ne.s32.totalorder %s2498_s17, %s2494_s16 }
  0x2e   : > { %p30_p2 = scmp.eq.s32.totalorder %s29_s13, 0  ;;  %p40_p6 = scmp.eq.s32.totalorder %s2502_s18, 0 }
  0x2f   : > { %p3686_p12 = scmp.eq.s32.totalorder %s2572_s19, 1  ;;  %p2193_p7 = scmp.lt.s32.totalorder %s2502_s18, 2 }
  0x30   : > { %s2639_s20 = scalar_select %p30_p2, %s2498_s17, %s32_s12  }
  0x31   : > { %p2633_p3 = por %p3686_p12, %p39_p1  ;;  %p41_p9 = por %p40_p6, %p39_p1 }
  0x32   : > { %s189_s24 = sand.u32 1, %s2498_s17   ;;  %s2036_s26 = sshll.u32 %s2502_s18, 8 }
  0x33   : > { %s3687_s14 = scalar_select %p2633_p3, 1, 0 }
  0x34   : > { %s2003_s25 = sshll.u32 %s189_s24, 4  ;;  %s2646_s29 = scalar_lea.hbm %s3673_s0, %s2036_s26 }
  0x35   : > { %s193_s30 = scalar_lea.vmem [#allocation2], %s2003_s25  ;;  %p2650_p11 = pnand %p2193_p7, %p41_p9 }
  0x36   : > { %s200_s5 = sshll.u32 %s193_s30, 4  ;;  %s2654_s7 = scalar_lea.sflag [#allocation3], %s189_s24  ;;  %s2648_s5 = int_to_ptr.vmem [resolvable:$true] %s200_s5 }
  0x37   : > { %s2376_s8 = scalar_lea.hbm %s2646_s29, 256  ;;  %p2378_p0 = pneg %p2650_p11 }
  0x38   : > { %p2377_p13 = scmp.ne.s32.totalorder %s2646_s29, %s2376_s8  ;;  %s2381_s12 = scalar_lea.hbm %s3673_s0, 512 }
  0x39   : > { %p2382_p1 = scmp.lt.s32.totalorder %s2646_s29, %s3673_s0  ;;  %p2383_p2 = scmp.lt.s32.totalorder %s2381_s12, %s2376_s8 }
  0x3a   : > { %p2379_p5 = pnand %p2378_p0, %p2377_p13 }
  0x3b   : > { %p2384_p6 = por %p2383_p2, %p2382_p1 }
  0x3c   : > { %p2380_p10 = pneg %p2379_p5 }
  0x3e   : > { %p2385_p12 = pnand %p2384_p6, %p2380_p10 }
  0x40   : > { %2388 = shalt.err (!%p2385_p12)
}
  0x41   : > { %s2389_s24 = scalar_lea.vmem %s2648_s5, 256  ;;  %s2508_s26 = smov [#allocation2]  }
  0x42   : > { %p2390_p7 = scmp.ne.s32.totalorder %s2648_s5, %s2389_s24  ;;  %s2394_s27 = sshll.u32 %s2508_s26, 4  ;;  %s2395_s27 = int_to_ptr.vmem [resolvable:$false] %s2394_s27 }
  0x43   : > { %s2396_s28 = scalar_lea.vmem %s2395_s27, 512  ;;  %p2397_p5 = scmp.lt.s32.totalorder %s2648_s5, %s2395_s27 }
  0x44   : > { %p2392_p9 = pnand %p2390_p7, %p2378_p0  ;;  %p2398_p3 = scmp.lt.s32.totalorder %s2396_s28, %s2389_s24 }
  0x46   : > { %p2393_p13 = pneg %p2392_p9  ;;  %p2399_p4 = por %p2398_p3, %p2397_p5 }
  0x48   : > { %p2400_p8 = pnand %p2399_p4, %p2393_p13 }
  0x4a   : > { %2403 = shalt.err (!%p2400_p8)
}
  0x4b   : > { %s2509_s30 = smov 16   ;;  %s2510_s8 = smov 1  }
  0x4c   : > { %2183 = dma.hbm_to_vmem [thread:$0]  (!%p2650_p11), %s2646_s29, 256, %s2648_s5, %s2654_s7, %s2509_s30, %s2509_s30, %s2510_s8  }
  0x4d   : > { %p3689_p0 = scmp.ne.s32.totalorder %s3684_s23, 0 }
  0x4e   : > { %s2678_s9 = sand.u32 (!%p3689_p0), 1, %s2494_s16   ;;  %p3690_p4 = scmp.ne.s32.totalorder (!%p3689_p0), %s3682_s21, 0 }
  0x4f   : > { %212 = sbr.rel (%p3689_p0) target bundleno = 615 (0x267), region = 32  ;;  %s2007_s10 = sshll.u32 (!%p3689_p0), %s2678_s9, 4 }
  0x50   : > { %s215_s12 = scalar_lea.sflag (!%p3689_p0), [#allocation3], %s2678_s9  ;;  %s2682_s13 = scalar_lea.vmem (!%p3689_p0), [#allocation2], %s2007_s10 }
  0x54   : > { %2473 = dma.done.wait (%p3690_p4), %s215_s12, 256  }
  0x55   : > { %2475 = vsyncadd (%p3690_p4), %s215_s12, 4294967040  ;;  %p3691_p8 = scmp.eq.s32.totalorder %s2572_s19, 0 }
  0x57   : > { %2477 = dma.done.wait (%p3691_p8), [#allocation6], 2304   ;;  %p3692_p3 = pmov %p3691_p8 }
  0x58   : > { %v2511_v0 = vmov 0   ;;  %v2692_v1 = vld [vmem:[#allocation5] sm:$0xff]  ;;  %v844_v2 = vld [vmem:[#allocation7 + $0x78] sm:$0xff]  ;;  %v842_v4 = vld [vmem:[#allocation7 + $0x68] sm:$0xff]  ;;  %v2512_v5 = vmov 1   ;;  %s2010_s21 = sshll.u32 %s2678_s9, 7 }
  0x59   : > { %2479 = vsyncadd (%p3692_p3), [#allocation6], 4294964992  ;;  %2248 = vset.pattern.permute.xlu0 %v2511_v0  ;;  %v843_v3 = vld [vmem:[#allocation7 + $0x70] sm:$0xff]  ;;  %2071 = vmatprep.subr.mxu0 %v844_v2  ;;  %v841_v6 = vld [vmem:[#allocation7 + $0x60] sm:$0xff]  ;;  %s3227_s23 = scalar_lea.vmem [#allocation9], %s2010_s21  ;;  %s3242_s29 = scalar_lea.vmem [#allocation8], %s2010_s21 }
  0x5a   : > { %278 = vperm.xlu0 %2248, %v2692_v1   ;;  %2127 = vmatprep.subr.mxu1 %v844_v2  ;;  %v840_v7 = vld [vmem:[#allocation7 + $0x58] sm:$0xff]  ;;  %v839_v8 = vld [vmem:[#allocation7 + $0x50] sm:$0xff]  ;;  %v838_v9 = vld [vmem:[#allocation7 + $0x48] sm:$0xff]  ;;  %s2037_s5 = sshll.u32 %s2572_s19, 11  ;;  %s1874_s6 = sshll.u32 %s3227_s23, 4  ;;  %s3593_s6 = int_to_ptr.vmem [resolvable:$true] %s1874_s6 }
  0x5b   : > { %2072 = vmatpush3.msra.mxu0 %v844_v2  ;;  %2143 = vmatpush3.msra.mxu1 %v844_v2  ;;  %v837_v10 = vld [vmem:[#allocation7 + $0x40] sm:$0xff]  ;;  %v836_v11 = vld [vmem:[#allocation7 + $0x38] sm:$0xff]  ;;  %v835_v12 = vld [vmem:[#allocation7 + $0x30] sm:$0xff]  ;;  %s1858_s7 = sshll.u32 %s3242_s29, 4  ;;  %s3591_s26 = scalar_lea.hbm %s3677_s4, %s2037_s5  ;;  %s3602_s7 = int_to_ptr.vmem [resolvable:$true] %s1858_s7 }
  0x5c   : > { %2073 = vmatprep.subr.mxu0 %v843_v3  ;;  %2128 = vmatprep.subr.mxu1 %v843_v3  ;;  %v834_v13 = vld [vmem:[#allocation7 + $0x28] sm:$0xff]  ;;  %v833_v14 = vld [vmem:[#allocation7 + $0x20] sm:$0xff]  ;;  %v832_v15 = vld [vmem:[#allocation7 + $0x18] sm:$0xff]  ;;  %s3600_s28 = scalar_lea.hbm %s3676_s3, %s2037_s5  ;;  %s1845_s30 = scalar_lea.sflag [#allocation10], %s2678_s9 }
  0x5d   : > { %2074 = vmatpush3.msra.mxu0 %v843_v3  ;;  %2144 = vmatpush3.msra.mxu1 %v843_v3  ;;  %v831_v16 = vld [vmem:[#allocation7 + $0x10] sm:$0xff]  ;;  %v830_v17 = vld [vmem:[#allocation7 + $0x8] sm:$0xff]  ;;  %v829_v18 = vld [vmem:[#allocation7] sm:$0xff]  ;;  %s2404_s8 = scalar_lea.vmem %s3593_s6, 2048  ;;  %p3693_p10 = scmp.ne.s32.totalorder %s3687_s14, 0 }
  0x5e   : > { %2249 = vset.pattern.permute.xlu0 %v2512_v5  ;;  %2075 = vmatprep.subr.mxu0 %v842_v4  ;;  %v2012_v20 = vld [vmem:[%s2682_s13] ss:$0 sm:$0xff]  ;;  %v2020_v21 = vld [vmem:[%s2682_s13 + $0x8] ss:$0 sm:$0xff]  ;;  %v2013_v22 = vld [vmem:[%s2682_s13 + $0x1] ss:$0 sm:$0xff]  ;;  %p2405_p11 = scmp.ne.s32.totalorder %s3593_s6, %s2404_s8 }
  0x5f   : > { %394 = vperm.xlu0 %2249, %v2692_v1   ;;  %2129 = vmatprep.subr.mxu1 %v842_v4  ;;  %v2021_v23 = vld [vmem:[%s2682_s13 + $0x9] ss:$0 sm:$0xff]  ;;  %v2014_v32 = vld [vmem:[%s2682_s13 + $0x2] ss:$0 sm:$0xff]  ;;  %v2022_v33 = vld [vmem:[%s2682_s13 + $0xa] ss:$0 sm:$0xff] }
  0x60   : > { %2076 = vmatpush3.msra.mxu0 %v842_v4  ;;  %2145 = vmatpush3.msra.mxu1 %v842_v4  ;;  %v2015_v35 = vld [vmem:[%s2682_s13 + $0x3] ss:$0 sm:$0xff]  ;;  %v2023_v36 = vld [vmem:[%s2682_s13 + $0xb] ss:$0 sm:$0xff]  ;;  %v2016_v37 = vld [vmem:[%s2682_s13 + $0x4] ss:$0 sm:$0xff]  ;;  %p2406_p1 = pnand %p2405_p11, %p3693_p10 }
  0x61   : > { %2077 = vmatprep.subr.mxu0 %v841_v6  ;;  %2130 = vmatprep.subr.mxu1 %v841_v6  ;;  %v2024_v40 = vld [vmem:[%s2682_s13 + $0xc] ss:$0 sm:$0xff]  ;;  %v2017_v44 = vld [vmem:[%s2682_s13 + $0x5] ss:$0 sm:$0xff]  ;;  %v2025_v45 = vld [vmem:[%s2682_s13 + $0xd] ss:$0 sm:$0xff] }
  0x62   : > { %2078 = vmatpush3.msra.mxu0 %v841_v6  ;;  %2146 = vmatpush3.msra.mxu1 %v841_v6  ;;  %p2407_p2 = pneg %p2406_p1  ;;  %s2522_s10 = smov [#allocation9]  }
  0x63   : > { %2079 = vmatprep.subr.mxu0 %v840_v7  ;;  %2131 = vmatprep.subr.mxu1 %v840_v7  ;;  %s2408_s12 = sshll.u32 %s2522_s10, 4  ;;  %s2409_s12 = int_to_ptr.vmem [resolvable:$false] %s2408_s12 }
  0x64   : > { %2080 = vmatpush3.msra.mxu0 %v840_v7  ;;  %2147 = vmatpush3.msra.mxu1 %v840_v7  ;;  %p2411_p6 = scmp.lt.s32.totalorder %s3593_s6, %s2409_s12 }
  0x65   : > { %2081 = vmatprep.subr.mxu0 %v839_v8  ;;  %2132 = vmatprep.subr.mxu1 %v839_v8 }
  0x66   : > { %2082 = vmatpush3.msra.mxu0 %v839_v8  ;;  %2148 = vmatpush3.msra.mxu1 %v839_v8 }
  0x67   : > { %2083 = vmatprep.subr.mxu0 %v838_v9  ;;  %2133 = vmatprep.subr.mxu1 %v838_v9 }
  0x68   : > { %2084 = vmatpush3.msra.mxu0 %v838_v9  ;;  %2149 = vmatpush3.msra.mxu1 %v838_v9 }
  0x69   : > { %2085 = vmatprep.subr.mxu0 %v837_v10  ;;  %2134 = vmatprep.subr.mxu1 %v837_v10 }
  0x6a   : > { %2086 = vmatpush3.msra.mxu0 %v837_v10  ;;  %2150 = vmatpush3.msra.mxu1 %v837_v10 }
  0x6b   : > { %2087 = vmatprep.subr.mxu0 %v836_v11  ;;  %2135 = vmatprep.subr.mxu1 %v836_v11 }
  0x6c   : > { %2088 = vmatpush3.msra.mxu0 %v836_v11  ;;  %2151 = vmatpush3.msra.mxu1 %v836_v11 }
  0x6d   : > { %2089 = vmatprep.subr.mxu0 %v835_v12  ;;  %2136 = vmatprep.subr.mxu1 %v835_v12 }
  0x6e   : > { %2090 = vmatpush3.msra.mxu0 %v835_v12  ;;  %2152 = vmatpush3.msra.mxu1 %v835_v12 }
  0x6f   : > { %2091 = vmatprep.subr.mxu0 %v834_v13  ;;  %2137 = vmatprep.subr.mxu1 %v834_v13 }
  0x70   : > { %2092 = vmatpush3.msra.mxu0 %v834_v13  ;;  %2153 = vmatpush3.msra.mxu1 %v834_v13 }
  0x71   : > { %2093 = vmatprep.subr.mxu0 %v833_v14  ;;  %2138 = vmatprep.subr.mxu1 %v833_v14 }
  0x72   : > { %2094 = vmatpush3.msra.mxu0 %v833_v14  ;;  %2154 = vmatpush3.msra.mxu1 %v833_v14  ;;  %v2513_v14 = vmov -1.0  }
  0x73   : > { %2095 = vmatprep.subr.mxu0 %v832_v15  ;;  %2139 = vmatprep.subr.mxu1 %v832_v15 }
  0x74   : > { %2096 = vmatpush3.msra.mxu0 %v832_v15  ;;  %2155 = vmatpush3.msra.mxu1 %v832_v15 }
  0x75   : > { %2097 = vmatprep.subr.mxu0 %v831_v16  ;;  %2140 = vmatprep.subr.mxu1 %v831_v16 }
  0x76   : > { %2098 = vmatpush3.msra.mxu0 %v831_v16  ;;  %2156 = vmatpush3.msra.mxu1 %v831_v16 }
  0x77   : > { %2099 = vmatprep.subr.mxu0 %v830_v17  ;;  %2141 = vmatprep.subr.mxu1 %v830_v17 }
  0x78   : > { %2100 = vmatpush3.msra.mxu0 %v830_v17  ;;  %2157 = vmatpush3.msra.mxu1 %v830_v17 }
  0x79   : > { %2101 = vmatprep.subr.mxu0 %v829_v18  ;;  %2142 = vmatprep.subr.mxu1 %v829_v18 }
  0x7a   : > { %2102 = vmatpush3.msra.mxu0 %v829_v18  ;;  %2158 = vmatpush3.msra.mxu1 %v829_v18 }
  0xd5   : > { %v2696_v19 = vpop.permute.xlu0 %278 }
  0xd6   : > { %v377_v24 = vmul.f32 %v2012_v20, %v2696_v19  ;;  %v385_v25 = vmul.f32 %v2020_v21, %v2696_v19  ;;  %v378_v26 = vmul.f32 %v2013_v22, %v2696_v19  ;;  %v386_v28 = vmul.f32 %v2021_v23, %v2696_v19  ;;  %v2018_v23 = vld [vmem:[%s2682_s13 + $0x6] ss:$0 sm:$0xff] }
  0xd7   : > { %v379_v42 = vmul.f32 %v2014_v32, %v2696_v19  ;;  %v387_v43 = vmul.f32 %v2022_v33, %v2696_v19  ;;  %v380_v48 = vmul.f32 %v2015_v35, %v2696_v19  ;;  %v388_v49 = vmul.f32 %v2023_v36, %v2696_v19 }
  0xd8   : > { %v2725_v52 = vmul.f32 %v2016_v37, %v2696_v19  ;;  %v2728_v53 = vmul.f32 %v2024_v40, %v2696_v19  ;;  %v2731_v56 = vmul.f32 %v2017_v44, %v2696_v19  ;;  %v2734_v57 = vmul.f32 %v2025_v45, %v2696_v19 }
  0xda   : > { %v2705_v27 = vpop.permute.xlu0 %394 }
  0xdb   : > { %v397_v29 = vadd.f32 %v2705_v27, %v377_v24  ;;  %v405_v30 = vadd.f32 %v2705_v27, %v385_v25  ;;  %v398_v31 = vadd.f32 %v2705_v27, %v378_v26  ;;  %v406_v34 = vadd.f32 %v2705_v27, %v386_v28 }
  0xdc   : > { %v399_v60 = vadd.f32 %v2705_v27, %v379_v42  ;;  %v2738_v61 = vadd.f32 %v2705_v27, %v387_v43  ;;  %v2741_v0 = vadd.f32 %v2705_v27, %v380_v48  ;;  %v2744_v2 = vadd.f32 %v2705_v27, %v388_v49 }
  0xdd   : > { %v429_v38 = vmul.f32 0.70710677, %v397_v29  ;;  %v437_v39 = vmul.f32 0.70710677, %v405_v30  ;;  %v430_v41 = vmul.f32 0.70710677, %v398_v31 }
  0xde   : > { %v438_v51 = vmul.f32 0.70710677, %v406_v34  ;;  %v2746_v3 = vmul.f32 0.5, %v397_v29  ;;  %v2748_v4 = vmul.f32 0.5, %v405_v30  ;;  %v2750_v11 = vmul.f32 0.5, %v398_v31 }
  0xdf   : > { %v477_v46 = vand.u32 2147483647, %v429_v38  ;;  %v485_v47 = vand.u32 2147483647, %v437_v39  ;;  %v478_v50 = vand.u32 2147483647, %v430_v41 }
  0xe0   : > { %v486_v6 = vand.u32 2147483647, %v438_v51  ;;  %vm445_vm0 = vcmp.ge.f32.partialorder %v429_v38, 0.0  ;;  %vm453_vm1 = vcmp.ge.f32.partialorder %v437_v39, 0.0  ;;  %vm446_vm2 = vcmp.ge.f32.partialorder %v430_v41, 0.0 }
  0xe1   : > { %v493_v54 = vmul.f32 0.3275911, %v477_v46  ;;  %v501_v55 = vmul.f32 0.3275911, %v485_v47  ;;  %v685_v58 = vsub.f32 0.0, %v477_v46  ;;  %v693_v5 = vsub.f32 0.0, %v485_v47 }
  0xe2   : > { %v494_v59 = vmul.f32 0.3275911, %v478_v50  ;;  %v686_v8 = vsub.f32 0.0, %v478_v50  ;;  %v502_v10 = vmul.f32 0.3275911, %v486_v6  ;;  %v2758_v15 = vsel %vm445_vm0, 1.0, %v2513_v14 }
  0xe3   : > { %v509_v62 = vadd.f32 1.0, %v493_v54  ;;  %v517_v63 = vadd.f32 1.0, %v501_v55  ;;  %v701_v9 = vmul.f32 %v685_v58, %v477_v46  ;;  %v2752_v12 = vmul.f32 0.70710677, %v399_v60 }
  0xe4   : > { %v510_v7 = vadd.f32 1.0, %v494_v59  ;;  %v2755_v13 = vmul.f32 0.70710677, %v2738_v61  ;;  %v709_v16 = vmul.f32 %v693_v5, %v485_v47  ;;  %v2760_v17 = vmul.f32 0.5, %v406_v34 }
  0xe5   : > { %2259 = vrcp.f32 %v509_v62  ;;  %v518_v18 = vadd.f32 1.0, %v502_v10  ;;  %v2763_v20 = vsel %vm453_vm1, 1.0, %v2513_v14  ;;  %v702_v21 = vmul.f32 %v686_v8, %v478_v50 }
  0xe6   : > { %2261 = vrcp.f32 %v517_v63  ;;  %v479_v22 = vand.u32 2147483647, %v2752_v12  ;;  %v717_v24 = vmul.f32 1.442695, %v701_v9  ;;  %v2768_v25 = vsel %vm446_vm2, 1.0, %v2513_v14 }
  0xe7   : > { %2263 = vrcp.f32 %v510_v7  ;;  %vm454_vm3 = vcmp.ge.f32.partialorder %v438_v51, 0.0  ;;  %v694_v26 = vsub.f32 0.0, %v486_v6  ;;  %v487_v30 = vand.u32 2147483647, %v2755_v13 }
  0xe8   : > { %2265 = vrcp.f32 %v518_v18  ;;  %v495_v28 = vmul.f32 0.3275911, %v479_v22  ;;  %v687_v29 = vsub.f32 0.0, %v479_v22  ;;  %v733_v31 = vmul.f32 1.442695, %v709_v16 }
  0xe9   : > { %v2772_v32 = vmul.f32 0.70710677, %v2741_v0  ;;  %v2775_v33 = vmul.f32 0.70710677, %v2744_v2  ;;  %v2778_v34 = vmul.f32 %v2018_v23, %v2696_v19  ;;  %v719_v35 = vmul.f32 1.442695, %v702_v21 }
  0xea   : > { %v511_v36 = vadd.f32 1.0, %v495_v28  ;;  %v503_v37 = vmul.f32 0.3275911, %v487_v30  ;;  %v695_v38 = vsub.f32 0.0, %v487_v30  ;;  %2267 = vpow2.f32 %v717_v24 }
  0xeb   : > { %v710_v39 = vmul.f32 %v694_v26, %v486_v6  ;;  %v480_v40 = vand.u32 2147483647, %v2772_v32  ;;  %v488_v41 = vand.u32 2147483647, %v2775_v33  ;;  %v2784_v42 = vsel %vm454_vm3, 1.0, %v2513_v14 }
  0xec   : > { %2269 = vrcp.f32 %v511_v36  ;;  %v703_v43 = vmul.f32 %v687_v29, %v479_v22  ;;  %v519_v44 = vadd.f32 1.0, %v503_v37  ;;  %v711_v45 = vmul.f32 %v695_v38, %v487_v30 }
  0xed   : > { %2271 = vpow2.f32 %v733_v31  ;;  %v496_v46 = vmul.f32 0.3275911, %v480_v40  ;;  %v688_v47 = vsub.f32 0.0, %v480_v40  ;;  %v2786_v48 = vmul.f32 0.5, %v399_v60 }
  0xee   : > { %2273 = vpow2.f32 %v719_v35  ;;  %vm447_vm4 = vcmp.ge.f32.partialorder %v2752_v12, 0.0  ;;  %v504_v49 = vmul.f32 0.3275911, %v488_v41  ;;  %v735_v54 = vmul.f32 1.442695, %v710_v39 }
  0xef   : > { %2275 = vrcp.f32 %v519_v44  ;;  %v512_v51 = vadd.f32 1.0, %v496_v46  ;;  %v2793_v55 = vadd.f32 %v2705_v27, %v2725_v52  ;;  %v721_v62 = vmul.f32 1.442695, %v703_v43 }
  0xf0   : > { %v704_v63 = vmul.f32 %v688_v47, %v480_v40  ;;  %v520_v60 = vadd.f32 1.0, %v504_v49  ;;  %vm455_vm5 = vcmp.ge.f32.partialorder %v2755_v13, 0.0  ;;  %v737_v6 = vmul.f32 1.442695, %v711_v45 }
  0xf1   : > { %2277 = vrcp.f32 %v512_v51  ;;  %v696_v8 = vsub.f32 0.0, %v488_v41  ;;  %v2801_v9 = vmul.f32 0.70710677, %v2793_v55  ;;  %v2808_v16 = vsel %vm447_vm4, 1.0, %v2513_v14 }
  0xf2   : > { %v2789_v50 = vpop.eup %2259  ;;  %2279 = vrcp.f32 %v520_v60  ;;  %v2811_v18 = vmul.f32 0.5, %v2738_v61  ;;  %v723_v23 = vmul.f32 1.442695, %v704_v63  ;;  %v2821_v28 = vsel %vm455_vm5, 1.0, %v2513_v14 }
  0xf3   : > { %v2795_v58 = vpop.eup %2261  ;;  %v541_v59 = vmul.f32 1.0614054, %v2789_v50  ;;  %2281 = vpow2.f32 %v735_v54  ;;  %v481_v12 = vand.u32 2147483647, %v2801_v9  ;;  %v712_v31 = vmul.f32 %v696_v8, %v488_v41 }
  0xf4   : > { %v549_v5 = vmul.f32 1.0614054, %v2795_v58  ;;  %v2803_v52 = vpop.eup %2263  ;;  %2283 = vpow2.f32 %v721_v62  ;;  %v2827_v38 = vadd.f32 %v2705_v27, %v2728_v53  ;;  %v2836_v47 = vadd.f32 %v2705_v27, %v2731_v56 }
  0xf5   : > { %v557_v7 = vadd.f32 -1.4531521, %v541_v59  ;;  %v542_v22 = vmul.f32 1.0614054, %v2803_v52  ;;  %v2815_v24 = vpop.eup %2265  ;;  %2285 = vpow2.f32 %v737_v6  ;;  %v497_v36 = vmul.f32 0.3275911, %v481_v12 }
  0xf6   : > { %v565_v10 = vadd.f32 -1.4531521, %v549_v5  ;;  %v550_v30 = vmul.f32 1.0614054, %v2815_v24  ;;  %v689_v37 = vsub.f32 0.0, %v481_v12  ;;  %2287 = vpow2.f32 %v723_v23 }
  0xf7   : > { %v573_v21 = vmul.f32 %v2789_v50, %v557_v7  ;;  %v558_v29 = vadd.f32 -1.4531521, %v542_v22  ;;  %v2268_v39 = vpop.eup %2267  ;;  %v513_v46 = vadd.f32 1.0, %v497_v36  ;;  %v739_v60 = vmul.f32 1.442695, %v712_v31 }
  0xf8   : > { %v581_v26 = vmul.f32 %v2795_v58, %v565_v10  ;;  %v566_v43 = vadd.f32 -1.4531521, %v550_v30  ;;  %v705_v41 = vmul.f32 %v689_v37, %v481_v12  ;;  %v2841_v5 = vmul.f32 0.70710677, %v2827_v38 }
  0xf9   : > { %v589_v61 = vadd.f32 1.4214138, %v573_v21  ;;  %v574_v40 = vmul.f32 %v2803_v52, %v558_v29  ;;  %v2831_v44 = vpop.eup %2269  ;;  %2289 = vrcp.f32 %v513_v46  ;;  %vm448_vm6 = vcmp.ge.f32.partialorder %v2772_v32, 0.0 }
  0xfa   : > { %v597_v35 = vadd.f32 1.4214138, %v581_v26  ;;  %v2272_v49 = vpop.eup %2271  ;;  %v582_v51 = vmul.f32 %v2815_v24, %v566_v43  ;;  %v543_v59 = vmul.f32 1.0614054, %v2831_v44  ;;  %v2849_v23 = vmul.f32 1.442695, %v705_v41 }
  0xfb   : > { %v605_v13 = vmul.f32 %v2789_v50, %v589_v61  ;;  %v590_v54 = vadd.f32 1.4214138, %v574_v40  ;;  %v2274_v62 = vpop.eup %2273  ;;  %v2852_v26 = vmul.f32 0.70710677, %v2836_v47  ;;  %2291 = vpow2.f32 %v739_v60 }
  0xfc   : > { %v613_v45 = vmul.f32 %v2795_v58, %v597_v35  ;;  %v2843_v6 = vpop.eup %2275  ;;  %v598_v8 = vadd.f32 1.4214138, %v582_v51  ;;  %v559_v10 = vadd.f32 -1.4531521, %v543_v59  ;;  %2293 = vpow2.f32 %v2849_v23 }
  0xfd   : > { %v621_v53 = vadd.f32 -0.28449672, %v605_v13  ;;  %v606_v56 = vmul.f32 %v2803_v52, %v590_v54  ;;  %v551_v22 = vmul.f32 1.0614054, %v2843_v6  ;;  %vm456_vm7 = vcmp.ge.f32.partialorder %v2775_v33, 0.0 }
  0xfe   : > { %v629_v63 = vadd.f32 -0.28449672, %v613_v45  ;;  %v2854_v12 = vpop.eup %2277  ;;  %v614_v30 = vmul.f32 %v2815_v24, %v598_v8  ;;  %v575_v31 = vmul.f32 %v2831_v44, %v559_v10  ;;  %v2923_v32 = vadd.f32 %v2705_v27, %v2778_v34 }
  0xff   : > { %v637_v7 = vmul.f32 %v2789_v50, %v621_v53  ;;  %v622_v29 = vadd.f32 -0.28449672, %v606_v56  ;;  %v2858_v35 = vpop.eup %2279  ;;  %v567_v37 = vadd.f32 -1.4531521, %v551_v22  ;;  %v544_v13 = vmul.f32 1.0614054, %v2854_v12 }
 0x100   : > { %v645_v21 = vmul.f32 %v2795_v58, %v629_v63  ;;  %v2282_v40 = vpop.eup %2281  ;;  %v630_v46 = vadd.f32 -0.28449672, %v614_v30  ;;  %v591_v41 = vadd.f32 1.4214138, %v575_v31  ;;  %v552_v63 = vmul.f32 1.0614054, %v2858_v35 }
 0x101   : > { %v653_v61 = vadd.f32 0.2548296, %v637_v7  ;;  %v638_v45 = vmul.f32 %v2803_v52, %v622_v29  ;;  %v2284_v53 = vpop.eup %2283  ;;  %v583_v51 = vmul.f32 %v2843_v6, %v567_v37  ;;  %v560_v59 = vadd.f32 -1.4531521, %v544_v13 }
 0x102   : > { %v661_v36 = vadd.f32 0.2548296, %v645_v21  ;;  %v2286_v7 = vpop.eup %2285  ;;  %v646_v60 = vmul.f32 %v2815_v24, %v630_v46  ;;  %v607_v10 = vmul.f32 %v2831_v44, %v591_v41  ;;  %vm449_vm8 = vcmp.ge.f32.partialorder %v2801_v9, 0.0 }
 0x103   : > { %v669_v43 = vmul.f32 %v2789_v50, %v653_v61  ;;  %v654_v8 = vadd.f32 0.2548296, %v638_v45  ;;  %v599_v21 = vadd.f32 1.4214138, %v583_v51  ;;  %v576_v22 = vmul.f32 %v2854_v12, %v560_v59 }
 0x104   : > { %v677_v54 = vmul.f32 %v2795_v58, %v661_v36  ;;  %v568_v61 = vadd.f32 -1.4531521, %v552_v63  ;;  %v662_v30 = vadd.f32 0.2548296, %v646_v60  ;;  %v623_v31 = vadd.f32 -0.28449672, %v607_v10  ;;  %v2288_v36 = vpop.eup %2287 }
 0x105   : > { %v749_v56 = vmul.f32 %v2268_v39, %v669_v43  ;;  %v670_v58 = vmul.f32 %v2803_v52, %v654_v8  ;;  %v615_v13 = vmul.f32 %v2843_v6, %v599_v21  ;;  %v592_v39 = vadd.f32 1.4214138, %v576_v22 }
 0x106   : > { %v757_v50 = vmul.f32 %v2272_v49, %v677_v54  ;;  %v584_v43 = vmul.f32 %v2858_v35, %v568_v61  ;;  %v678_v49 = vmul.f32 %v2815_v24, %v662_v30  ;;  %v639_v41 = vmul.f32 %v2831_v44, %v623_v31  ;;  %v2877_v63 = vpop.eup %2289 }
 0x107   : > { %v765_v29 = vsub.f32 1.0, %v749_v56  ;;  %v750_v46 = vmul.f32 %v2274_v62, %v670_v58  ;;  %v631_v51 = vadd.f32 -0.28449672, %v615_v13  ;;  %v608_v52 = vmul.f32 %v2854_v12, %v592_v39 }
 0x108   : > { %v773_v37 = vsub.f32 1.0, %v757_v50  ;;  %v600_v59 = vadd.f32 1.4214138, %v584_v43  ;;  %v758_v60 = vmul.f32 %v2282_v40, %v678_v49  ;;  %v655_v10 = vadd.f32 0.2548296, %v639_v41  ;;  %v2292_v31 = vpop.eup %2291 }
 0x109   : > { %v781_v45 = vmul.f32 %v765_v29, %v2758_v15  ;;  %v766_v8 = vsub.f32 1.0, %v750_v46  ;;  %v647_v15 = vmul.f32 %v2843_v6, %v631_v51  ;;  %v624_v24 = vadd.f32 -0.28449672, %v608_v52 }
 0x10a   : > { %v789_v54 = vmul.f32 %v773_v37, %v2763_v20  ;;  %v616_v62 = vmul.f32 %v2858_v35, %v600_v59  ;;  %v774_v22 = vsub.f32 1.0, %v758_v60  ;;  %v671_v61 = vmul.f32 %v2831_v44, %v655_v10 }
 0x10b   : > { %v797_v56 = vadd.f32 1.0, %v781_v45  ;;  %v782_v21 = vmul.f32 %v766_v8, %v2768_v25  ;;  %v663_v58 = vadd.f32 0.2548296, %v647_v15  ;;  %v640_v40 = vmul.f32 %v2854_v12, %v624_v24 }
 0x10c   : > { %v805_v50 = vadd.f32 1.0, %v789_v54  ;;  %v632_v30 = vadd.f32 -0.28449672, %v616_v62  ;;  %v790_v13 = vmul.f32 %v774_v22, %v2784_v42  ;;  %v751_v39 = vmul.f32 %v2284_v53, %v671_v61 }
 0x10d   : > { %v813_v20 = vmul.f32 %v797_v56, %v2746_v3  ;;  %v798_v37 = vadd.f32 1.0, %v782_v21  ;;  %v545_v43 = vmul.f32 1.0614054, %v2877_v63  ;;  %v679_v3 = vmul.f32 %v2843_v6, %v663_v58  ;;  %v2026_v58 = vld [vmem:[%s2682_s13 + $0xe] ss:$0 sm:$0xff] }
 0x10e   : > { %v821_v29 = vmul.f32 %v805_v50, %v2748_v4  ;;  %v656_v25 = vadd.f32 0.2548296, %v640_v40  ;;  %v648_v44 = vmul.f32 %v2858_v35, %v632_v30  ;;  %v2892_v4 = vand.u32 2147483647, %v2841_v5 }
 0x10f   : > { %2103 = vmatprep.mubr.f32.mxu0 %v813_v20  ;;  %v814_v45 = vmul.f32 %v798_v37, %v2750_v11  ;;  %v806_v46 = vadd.f32 1.0, %v790_v13  ;;  %v767_v49 = vsub.f32 1.0, %v751_v39  ;;  %v561_v41 = vadd.f32 -1.4531521, %v545_v43 }
 0x110   : > { %2115 = vmatprep.mubr.f32.mxu1 %v821_v29  ;;  %v759_v54 = vmul.f32 %v2286_v7, %v679_v3  ;;  %v672_v42 = vmul.f32 %v2854_v12, %v656_v25  ;;  %v664_v53 = vadd.f32 0.2548296, %v648_v44  ;;  %v505_v51 = vmul.f32 0.3275911, %v2892_v4 }
 0x111   : > { %2104 = vmatmul.mubr.f32.vlgmr.msra.gmra.mxu0 %v814_v45  ;;  %v822_v6 = vmul.f32 %v806_v46, %v2760_v17  ;;  %v783_v52 = vmul.f32 %v767_v49, %v2808_v16  ;;  %v577_v59 = vmul.f32 %v2877_v63, %v561_v41  ;;  %v2905_v10 = vadd.f32 %v2705_v27, %v2734_v57  ;;  %v2294_v41 = vpop.eup %2293 }
 0x112   : > { %v775_v56 = vsub.f32 1.0, %v759_v54  ;;  %v752_v11 = vmul.f32 %v2288_v36, %v672_v42  ;;  %v680_v8 = vmul.f32 %v2858_v35, %v664_v53  ;;  %v521_v60 = vadd.f32 1.0, %v505_v51 }
 0x113   : > { %2116 = vmatmul.mubr.f32.vlgmr.msra.gmra.mxu1 %v822_v6  ;;  %v799_v7 = vadd.f32 1.0, %v783_v52  ;;  %v593_v12 = vadd.f32 1.4214138, %v577_v59  ;;  %v416_v36 = vmul.f32 0.5, %v2741_v0  ;;  %v464_v35 = vsel %vm448_vm6, 1.0, %v2513_v14 }
 0x114   : > { %v791_v17 = vmul.f32 %v775_v56, %v2821_v28  ;;  %v768_v16 = vsub.f32 1.0, %v752_v11  ;;  %v760_v50 = vmul.f32 %v2292_v31, %v680_v8  ;;  %2295 = vrcp.f32 %v521_v60  ;;  %v2019_v31 = vld [vmem:[%s2682_s13 + $0x7] ss:$0 sm:$0xff]  ;;  %v2027_v52 = vld [vmem:[%s2682_s13 + $0xf] ss:$0 sm:$0xff]  ;;  %s2410_s13 = scalar_lea.vmem %s2409_s12, 4096 }
 0x115   : > { %v815_v23 = vmul.f32 %v799_v7, %v2786_v48  ;;  %v609_v15 = vmul.f32 %v2877_v63, %v593_v12  ;;  %v482_v28 = vand.u32 2147483647, %v2852_v26  ;;  %v472_v48 = vsel %vm456_vm7, 1.0, %v2513_v14  ;;  %p2412_p12 = scmp.lt.s32.totalorder %s2410_s13, %s2404_s8 }
 0x116   : > { %v807_v24 = vadd.f32 1.0, %v791_v17  ;;  %v784_v62 = vmul.f32 %v768_v16, %v464_v35  ;;  %v776_v57 = vsub.f32 1.0, %v760_v50  ;;  %v2919_v0 = vmul.f32 0.70710677, %v2905_v10 }
 0x117   : > { %2106 = vmatprep.mubr.f32.mxu0 %v815_v23  ;;  %v625_v20 = vadd.f32 -0.28449672, %v609_v15  ;;  %v498_v29 = vmul.f32 0.3275911, %v482_v28  ;;  %v697_v30 = vsub.f32 0.0, %v2892_v4  ;;  %v424_v13 = vmul.f32 0.5, %v2744_v2  ;;  %p2413_p7 = por %p2412_p12, %p2411_p6 }
 0x118   : > { %v823_v21 = vmul.f32 %v807_v24, %v2811_v18  ;;  %v800_v22 = vadd.f32 1.0, %v784_v62  ;;  %v792_v61 = vmul.f32 %v776_v57, %v472_v48  ;;  %v490_v33 = vand.u32 2147483647, %v2919_v0 }
 0x119   : > { %v641_v40 = vmul.f32 %v2877_v63, %v625_v20  ;;  %v514_v34 = vadd.f32 1.0, %v498_v29  ;;  %v391_v18 = vmul.f32 %v2026_v58, %v2696_v19  ;;  %v2934_v44 = vmul.f32 0.70710677, %v2923_v32  ;;  %p2414_p9 = pnand %p2413_p7, %p2407_p2 }
 0x11a   : > { %2118 = vmatprep.mubr.f32.mxu1 %v823_v21  ;;  %v816_v37 = vmul.f32 %v800_v22, %v416_v36  ;;  %v808_v39 = vadd.f32 1.0, %v792_v61  ;;  %v506_v3 = vmul.f32 0.3275911, %v490_v33  ;;  %v384_v45 = vmul.f32 %v2019_v31, %v2696_v19 }
 0x11b   : > { %v657_v43 = vadd.f32 0.2548296, %v641_v40  ;;  %2297 = vrcp.f32 %v514_v34  ;;  %v713_v49 = vmul.f32 %v697_v30, %v2892_v4  ;;  %v483_v54 = vand.u32 2147483647, %v2934_v44 }
 0x11c   : > { %2107 = vmatmul.mubr.f32.gmra.mxu0 %v816_v37  ;;  %v824_v25 = vmul.f32 %v808_v39, %v424_v13  ;;  %v522_v2 = vadd.f32 1.0, %v506_v3  ;;  %v2942_v42 = vadd.f32 %v2705_v27, %v391_v18  ;;  %v2945_v53 = vadd.f32 %v2705_v27, %v384_v45 }
 0x11d   : > { %v673_v46 = vmul.f32 %v2877_v63, %v657_v43  ;;  %v499_v6 = vmul.f32 0.3275911, %v483_v54  ;;  %v465_v4 = vsel %vm449_vm8, 1.0, %v2513_v14  ;;  %v741_v56 = vmul.f32 1.442695, %v713_v49 }
 0x11e   : > { %2119 = vmatmul.mubr.f32.gmra.mxu1 %v824_v25  ;;  %2299 = vrcp.f32 %v522_v2  ;;  %v2952_v9 = vmul.f32 0.70710677, %v2942_v42  ;;  %v690_v8 = vsub.f32 0.0, %v482_v28  ;;  %v2956_v7 = vmul.f32 0.70710677, %v2945_v53 }
 0x11f   : > { %v753_v51 = vmul.f32 %v2294_v41, %v673_v46  ;;  %v515_v60 = vadd.f32 1.0, %v499_v6  ;;  %v392_v16 = vmul.f32 %v2027_v52, %v2696_v19  ;;  %v698_v23 = vsub.f32 0.0, %v490_v33 }
 0x120   : > { %v2959_v17 = vand.u32 2147483647, %v2952_v9  ;;  %v417_v36 = vmul.f32 0.5, %v2793_v55  ;;  %v706_v57 = vmul.f32 %v690_v8, %v482_v28  ;;  %v2969_v48 = vand.u32 2147483647, %v2956_v7 }
 0x121   : > { %v2948_v63 = vpop.eup %2295  ;;  %v769_v59 = vsub.f32 1.0, %v753_v51  ;;  %2301 = vrcp.f32 %v515_v60  ;;  %v2965_v24 = vadd.f32 %v2705_v27, %v392_v16  ;;  %v714_v22 = vmul.f32 %v698_v23, %v490_v33 }
 0x122   : > { %v553_v11 = vmul.f32 1.0614054, %v2948_v63  ;;  %v507_v15 = vmul.f32 0.3275911, %v2959_v17  ;;  %2303 = vpow2.f32 %v741_v56  ;;  %v500_v61 = vmul.f32 0.3275911, %v2969_v48 }
 0x123   : > { %v785_v12 = vmul.f32 %v769_v59, %v465_v4  ;;  %v691_v29 = vsub.f32 0.0, %v483_v54  ;;  %v2975_v27 = vmul.f32 0.70710677, %v2965_v24  ;;  %v2514_v58 = vmov 2  }
 0x124   : > { %v569_v50 = vadd.f32 -1.4531521, %v553_v11  ;;  %v523_v19 = vadd.f32 1.0, %v507_v15  ;;  %2250 = vset.pattern.permute.xlu1 %v2514_v58  ;;  %v727_v30 = vmul.f32 1.442695, %v706_v57  ;;  %v516_v31 = vadd.f32 1.0, %v500_v61 }
 0x125   : > { %v801_v35 = vadd.f32 1.0, %v785_v12  ;;  %1055 = vperm.xlu1 %2250, %v2692_v1   ;;  %v2981_v33 = vand.u32 2147483647, %v2975_v27  ;;  %v743_v39 = vmul.f32 1.442695, %v714_v22  ;;  %vm457_vm9 = vcmp.ge.f32.partialorder %v2841_v5, 0.0 }
 0x126   : > { %v585_v62 = vmul.f32 %v2948_v63, %v569_v50  ;;  %2305 = vrcp.f32 %v523_v19  ;;  %v707_v43 = vmul.f32 %v691_v29, %v483_v54  ;;  %v2515_v46 = vmov 3  }
 0x127   : > { %v817_v20 = vmul.f32 %v801_v35, %v417_v36  ;;  %2307 = vrcp.f32 %v516_v31  ;;  %v508_v3 = vmul.f32 0.3275911, %v2981_v33  ;;  %v699_v49 = vsub.f32 0.0, %v2959_v17 }
 0x128   : > { %v601_v21 = vadd.f32 1.4214138, %v585_v62  ;;  %v2972_v55 = vpop.eup %2297  ;;  %2309 = vpow2.f32 %v727_v30  ;;  %v2516_v54 = vmov 5   ;;  %v729_v4 = vmul.f32 1.442695, %v707_v43 }
 0x129   : > { %2109 = vmatprep.mubr.f32.mxu0 %v817_v20  ;;  %v546_v40 = vmul.f32 1.0614054, %v2972_v55  ;;  %2251 = vset.pattern.permute.xlu1 %v2515_v46  ;;  %v524_v2 = vadd.f32 1.0, %v508_v3  ;;  %2311 = vpow2.f32 %v743_v39  ;;  %v692_v59 = vsub.f32 0.0, %v2969_v48  ;;  %v2323_v39 = vld [vmem:[#allocation5] sm:$0xff] }
 0x12a   : > { %v617_v28 = vmul.f32 %v2948_v63, %v601_v21  ;;  %1139 = vperm.xlu1 %2251, %v2692_v1   ;;  %2253 = vset.pattern.permute.xlu0 %v2516_v54  ;;  %v425_v16 = vmul.f32 0.5, %v2827_v38  ;;  %v715_v50 = vmul.f32 %v699_v49, %v2959_v17  ;;  %v2517_v23 = vmov 4  }
 0x12b   : > { %v562_v13 = vadd.f32 -1.4531521, %v546_v40  ;;  %v2983_v34 = vpop.eup %2299  ;;  %2313 = vrcp.f32 %v524_v2  ;;  %1339 = vperm.xlu0 %2253, %v2692_v1   ;;  %v708_v57 = vmul.f32 %v692_v59, %v2969_v48  ;;  %v2518_v20 = vmov 8  }
 0x12c   : > { %v633_v37 = vadd.f32 -0.28449672, %v617_v28  ;;  %v554_v45 = vmul.f32 1.0614054, %v2983_v34  ;;  %2315 = vpow2.f32 %v729_v4  ;;  %vm450_vm10 = vcmp.ge.f32.partialorder %v2852_v26, 0.0 }
 0x12d   : > { %v578_v25 = vmul.f32 %v2972_v55, %v562_v13  ;;  %v745_v61 = vmul.f32 1.442695, %v715_v50  ;;  %v700_v48 = vsub.f32 0.0, %v2981_v33  ;;  %v2519_v30 = vmov 6  }
 0x12e   : > { %v649_v18 = vmul.f32 %v2948_v63, %v633_v37  ;;  %v570_v6 = vadd.f32 -1.4531521, %v554_v45  ;;  %v2992_v52 = vpop.eup %2301  ;;  %2252 = vset.pattern.permute.xlu1 %v2517_v23  ;;  %v731_v13 = vmul.f32 1.442695, %v708_v57  ;;  %vm458_vm11 = vcmp.ge.f32.partialorder %v2919_v0, 0.0 }
 0x12f   : > { %v594_v51 = vadd.f32 1.4214138, %v578_v25  ;;  %v547_v60 = vmul.f32 1.0614054, %v2992_v52  ;;  %v2304_v12 = vpop.eup %2303  ;;  %1239 = vperm.xlu1 %2252, %v2692_v1   ;;  %2256 = vset.pattern.permute.xlu0 %v2518_v20  ;;  %v2520_v25 = vmov 9   ;;  %2317 = vpow2.f32 %v745_v61 }
 0x130   : > { %v665_v41 = vadd.f32 0.2548296, %v649_v18  ;;  %v586_v8 = vmul.f32 %v2983_v34, %v570_v6  ;;  %1639 = vperm.xlu0 %2256, %v2692_v1   ;;  %v716_v2 = vmul.f32 %v700_v48, %v2981_v33  ;;  %2319 = vpow2.f32 %v731_v13 }
 0x131   : > { %v610_v11 = vmul.f32 %v2972_v55, %v594_v51  ;;  %v563_v62 = vadd.f32 -1.4531521, %v547_v60  ;;  %vm451_vm12 = vcmp.ge.f32.partialorder %v2934_v44, 0.0  ;;  %vm459_vm13 = vcmp.ge.f32.partialorder %v2952_v9, 0.0 }
 0x132   : > { %v681_v56 = vmul.f32 %v2948_v63, %v665_v41  ;;  %v602_v15 = vadd.f32 1.4214138, %v586_v8  ;;  %v473_v63 = vsel %vm457_vm9, 1.0, %v2513_v14  ;;  %v747_v23 = vmul.f32 1.442695, %v716_v2 }
 0x133   : > { %v626_v35 = vadd.f32 -0.28449672, %v610_v11  ;;  %v3007_v38 = vpop.eup %2305  ;;  %v579_v22 = vmul.f32 %v2992_v52, %v563_v62  ;;  %2254 = vset.pattern.permute.xlu1 %v2519_v30  ;;  %v2521_v11 = vmov 7   ;;  %v467_v13 = vsel %vm451_vm12, 1.0, %v2513_v14 }
 0x134   : > { %v761_v36 = vmul.f32 %v2304_v12, %v681_v56  ;;  %v618_v21 = vmul.f32 %v2983_v34, %v602_v15  ;;  %v555_v5 = vmul.f32 1.0614054, %v3007_v38  ;;  %v3016_v31 = vpop.eup %2307  ;;  %1439 = vperm.xlu1 %2254, %v2323_v39   ;;  %2258 = vset.pattern.permute.xlu0 %v2520_v25  ;;  %2321 = vpow2.f32 %v747_v23 }
 0x135   : > { %v642_v19 = vmul.f32 %v2972_v55, %v626_v35  ;;  %v595_v40 = vadd.f32 1.4214138, %v579_v22  ;;  %v2310_v45 = vpop.eup %2309  ;;  %v548_v49 = vmul.f32 1.0614054, %v3016_v31  ;;  %vm452_vm14 = vcmp.ge.f32.partialorder %v2956_v7, 0.0 }
 0x136   : > { %v777_v17 = vsub.f32 1.0, %v761_v36  ;;  %v634_v28 = vadd.f32 -0.28449672, %v618_v21  ;;  %v571_v37 = vadd.f32 -1.4531521, %v555_v5  ;;  %v2312_v4 = vpop.eup %2311  ;;  %v418_v36 = vmul.f32 0.5, %v2836_v47 }
 0x137   : > { %v658_v58 = vadd.f32 0.2548296, %v642_v19  ;;  %v611_v18 = vmul.f32 %v2992_v52, %v595_v40  ;;  %v564_v56 = vadd.f32 -1.4531521, %v548_v49  ;;  %v474_v19 = vsel %vm458_vm11, 1.0, %v2513_v14 }
 0x138   : > { %v793_v29 = vmul.f32 %v777_v17, %v473_v63  ;;  %v650_v3 = vmul.f32 %v2983_v34, %v634_v28  ;;  %v587_v46 = vmul.f32 %v3007_v38, %v571_v37  ;;  %2255 = vset.pattern.permute.xlu1 %v2521_v11  ;;  %v3028_v8 = vpop.eup %2313  ;;  %vm460_vm15 = vcmp.ge.f32.partialorder %v2975_v27, 0.0 }
 0x139   : > { %v674_v43 = vmul.f32 %v2972_v55, %v658_v58  ;;  %v627_v54 = vadd.f32 -0.28449672, %v611_v18  ;;  %v466_v55 = vsel %vm450_vm10, 1.0, %v2513_v14  ;;  %1539 = vperm.xlu1 %2255, %v2323_v39   ;;  %v580_v26 = vmul.f32 %v3016_v31, %v564_v56 }
 0x13a   : > { %v809_v1 = vadd.f32 1.0, %v793_v29  ;;  %v666_v6 = vadd.f32 0.2548296, %v650_v3  ;;  %v603_v59 = vadd.f32 1.4214138, %v587_v46  ;;  %v420_v7 = vmul.f32 0.5, %v2945_v53 }
 0x13b   : > { %v754_v51 = vmul.f32 %v2310_v45, %v674_v43  ;;  %v643_v12 = vmul.f32 %v2992_v52, %v627_v54  ;;  %v556_v50 = vmul.f32 1.0614054, %v3028_v8  ;;  %v596_v57 = vadd.f32 1.4214138, %v580_v26 }
 0x13c   : > { %v825_v41 = vmul.f32 %v809_v1, %v425_v16  ;;  %v682_v33 = vmul.f32 %v2983_v34, %v666_v6  ;;  %v619_v16 = vmul.f32 %v3007_v38, %v603_v59  ;;  %v2316_v34 = vpop.eup %2315  ;;  %v475_v54 = vsel %vm459_vm13, 1.0, %v2513_v14 }
 0x13d   : > { %v770_v60 = vsub.f32 1.0, %v754_v51  ;;  %v659_v62 = vadd.f32 0.2548296, %v643_v12  ;;  %v572_v20 = vadd.f32 -1.4531521, %v556_v50  ;;  %2257 = vset.pattern.permute.xlu1 %v2520_v25  ;;  %v612_v47 = vmul.f32 %v3016_v31, %v596_v57  ;;  %v2318_v3 = vpop.eup %2317 }
 0x13e   : > { %2121 = vmatprep.mubr.f32.mxu1 %v825_v41  ;;  %v762_v15 = vmul.f32 %v2312_v4, %v682_v33  ;;  %v635_v63 = vadd.f32 -0.28449672, %v619_v16  ;;  %1739 = vperm.xlu1 %2257, %v2323_v39   ;;  %v2320_v2 = vpop.eup %2319  ;;  %v427_v59 = vmul.f32 0.5, %v2942_v42  ;;  %v476_v23 = vsel %vm460_vm15, 1.0, %v2513_v14 }
 0x13f   : > { %v786_v35 = vmul.f32 %v770_v60, %v466_v55  ;;  %v675_v22 = vmul.f32 %v2992_v52, %v659_v62  ;;  %v588_v61 = vmul.f32 %v3028_v8, %v572_v20  ;;  %v628_v0 = vadd.f32 -0.28449672, %v612_v47 }
 0x140   : > { %v778_v21 = vsub.f32 1.0, %v762_v15  ;;  %v651_v5 = vmul.f32 %v3007_v38, %v635_v63  ;;  %v426_v52 = vmul.f32 0.5, %v2905_v10  ;;  %v419_v10 = vmul.f32 0.5, %v2923_v32 }
 0x141   : > { %v802_v17 = vadd.f32 1.0, %v786_v35  ;;  %v755_v58 = vmul.f32 %v2316_v34, %v675_v22  ;;  %v604_v40 = vadd.f32 1.4214138, %v588_v61  ;;  %v644_v43 = vmul.f32 %v3016_v31, %v628_v0  ;;  %v2322_v60 = vpop.eup %2321 }
 0x142   : > { %v794_v29 = vmul.f32 %v778_v21, %v474_v19  ;;  %v667_v28 = vadd.f32 0.2548296, %v651_v5  ;;  %v990_v27 = vlaneseq }
 0x143   : > { %v818_v48 = vmul.f32 %v802_v17, %v418_v36  ;;  %v771_v37 = vsub.f32 1.0, %v755_v58  ;;  %v620_v39 = vmul.f32 %v3028_v8, %v604_v40  ;;  %v660_v45 = vadd.f32 0.2548296, %v644_v43 }
 0x144   : > { %v810_v30 = vadd.f32 1.0, %v794_v29  ;;  %v683_v1 = vmul.f32 %v3007_v38, %v667_v28  ;;  %v991_v53 = vshrl.u32 %v990_v27, 7 }
 0x145   : > { %2110 = vmatmul.mubr.f32.gmra.mxu0 %v818_v48  ;;  %v787_v44 = vmul.f32 %v771_v37, %v467_v13  ;;  %v636_v46 = vadd.f32 -0.28449672, %v620_v39  ;;  %v676_v38 = vmul.f32 %v3016_v31, %v660_v45  ;;  %v468_v31 = vsel %vm452_vm14, 1.0, %v2513_v14 }
 0x146   : > { %v826_v18 = vmul.f32 %v810_v30, %v426_v52  ;;  %v763_v25 = vmul.f32 %v2318_v3, %v683_v1  ;;  %v3070_v34 = vsub.s32 0, %v991_v53  ;;  %v3072_v14 = vsub.s32 1, %v991_v53 }
 0x147   : > { %v803_v49 = vadd.f32 1.0, %v787_v44  ;;  %v652_v51 = vmul.f32 %v3028_v8, %v636_v46  ;;  %v756_v9 = vmul.f32 %v2320_v2, %v676_v38  ;;  %v3074_v17 = vsub.s32 2, %v991_v53 }
 0x148   : > { %2122 = vmatmul.mubr.f32.gmra.mxu1 %v826_v18  ;;  %v779_v41 = vsub.f32 1.0, %v763_v25  ;;  %v3078_v19 = vsub.s32 4, %v991_v53  ;;  %v3080_v21 = vsub.s32 5, %v991_v53  ;;  %v3082_v22 = vsub.s32 6, %v991_v53 }
 0x149   : > { %v819_v6 = vmul.f32 %v803_v49, %v419_v10  ;;  %v668_v55 = vadd.f32 0.2548296, %v652_v51  ;;  %v772_v32 = vsub.f32 1.0, %v756_v9  ;;  %v3084_v5 = vsub.s32 7, %v991_v53 }
 0x14a   : > { %v795_v4 = vmul.f32 %v779_v41, %v475_v54 }
 0x14b   : > { %2112 = vmatprep.mubr.f32.mxu0 %v819_v6  ;;  %v684_v11 = vmul.f32 %v3028_v8, %v668_v55  ;;  %v788_v12 = vmul.f32 %v772_v32, %v468_v31  ;;  %v428_v8 = vmul.f32 0.5, %v2965_v24  ;;  %v3076_v24 = vsub.s32 3, %v991_v53 }
 0x14c   : > { %v811_v56 = vadd.f32 1.0, %v795_v4 }
 0x14d   : > { %v764_v16 = vmul.f32 %v2322_v60, %v684_v11  ;;  %v804_v26 = vadd.f32 1.0, %v788_v12 }
 0x14e   : > { %v827_v33 = vmul.f32 %v811_v56, %v427_v59 }
 0x14f   : > { %v780_v50 = vsub.f32 1.0, %v764_v16  ;;  %v820_v42 = vmul.f32 %v804_v26, %v420_v7 }
 0x150   : > { %2124 = vmatprep.mubr.f32.mxu1 %v827_v33 }
 0x151   : > { %v796_v36 = vmul.f32 %v780_v50, %v476_v23  ;;  %2113 = vmatmul.mubr.f32.gmra.mxu0 %v820_v42 }
 0x153   : > { %v812_v35 = vadd.f32 1.0, %v796_v36 }
 0x155   : > { %v828_v15 = vmul.f32 %v812_v35, %v428_v8 }
 0x157   : > { %2125 = vmatmul.mubr.f32.gmra.mxu1 %v828_v15 }
 0x1a0   : > { %v3062_v62 = vpop.permute.xlu1 %1055 }
 0x1a5   : > { %v3064_v63 = vpop.permute.xlu1 %1139 }
 0x1a6   : > { %v3104_v30 = vpop.permute.xlu0 %1339 }
 0x1aa   : > { %v3066_v57 = vpop.permute.xlu1 %1239 }
 0x1af   : > { %v3068_v20 = vpop.permute.xlu1 %1439 }
 0x1b4   : > { %v3096_v28 = vpop.permute.xlu1 %1539 }
 0x1b9   : > { %v3139_v11 = vpop.permute.xlu1 %1739 }
 0x1d1   : > { %v3086_v47 = vpop.f32.mrf.mxu0 }
 0x1d2   : > { %v997_v61 = vrot.slane %v3086_v47, %v3070_v34  ;;  %v1081_v48 = vrot.slane %v3086_v47, %v3072_v14  ;;  %v1181_v29 = vrot.slane %v3086_v47, %v3074_v17  ;;  %v1281_v58 = vrot.slane %v3086_v47, %v3076_v24 }
 0x1d3   : > { %v1381_v0 = vrot.slane %v3086_v47, %v3078_v19  ;;  %v1481_v40 = vrot.slane %v3086_v47, %v3080_v21  ;;  %v3102_v52 = vpop.f32.mrf.mxu1  ;;  %v1581_v1 = vrot.slane %v3086_v47, %v3082_v22  ;;  %v1681_v43 = vrot.slane %v3086_v47, %v3084_v5  ;;  %v3129_v51 = vpop.f32.mrf.mxu0 }
 0x1d4   : > { %v1059_v37 = vmul.f32 %v3062_v62, %v997_v61  ;;  %v1143_v13 = vmul.f32 %v3064_v63, %v1081_v48  ;;  %v1243_v39 = vmul.f32 %v3066_v57, %v1181_v29  ;;  %v1343_v3 = vmul.f32 %v3104_v30, %v1281_v58 }
 0x1d5   : > { %v1029_v18 = vrot.slane %v3102_v52, %v3070_v34  ;;  %v1113_v44 = vrot.slane %v3102_v52, %v3072_v14  ;;  %v1213_v45 = vrot.slane %v3102_v52, %v3074_v17  ;;  %v1313_v46 = vrot.slane %v3102_v52, %v3076_v24  ;;  %v3155_v35 = vpop.f32.mrf.mxu1 }
 0x1d6   : > { %v1159_v25 = vadd.f32 %v1143_v13, %v1059_v37  ;;  %v1413_v10 = vrot.slane %v3102_v52, %v3078_v19  ;;  %v1443_v49 = vmul.f32 %v3068_v20, %v1381_v0  ;;  %v1513_v38 = vrot.slane %v3102_v52, %v3080_v21 }
 0x1d7   : > { %v1067_v2 = vmul.f32 %v3062_v62, %v1029_v18  ;;  %v1151_v41 = vmul.f32 %v3064_v63, %v1113_v44  ;;  %v1543_v54 = vmul.f32 %v3096_v28, %v1481_v40  ;;  %v1251_v4 = vmul.f32 %v3066_v57, %v1213_v45 }
 0x1d8   : > { %v1259_v6 = vadd.f32 %v1243_v39, %v1159_v25  ;;  %v1613_v9 = vrot.slane %v3102_v52, %v3082_v22  ;;  %v1351_v59 = vmul.f32 %v3104_v30, %v1313_v46  ;;  %v1451_v56 = vmul.f32 %v3068_v20, %v1413_v10 }
 0x1d9   : > { %v1167_v55 = vadd.f32 %v1151_v41, %v1067_v2  ;;  %v1713_v32 = vrot.slane %v3102_v52, %v3084_v5  ;;  %v993_v31 = vrot.slane %v3129_v51, %v3070_v34  ;;  %v1077_v33 = vrot.slane %v3129_v51, %v3072_v14 }
 0x1da   : > { %v1359_v60 = vadd.f32 %v1343_v3, %v1259_v6  ;;  %v1177_v12 = vrot.slane %v3129_v51, %v3074_v17  ;;  %v1551_v7 = vmul.f32 %v3096_v28, %v1513_v38  ;;  %v1277_v26 = vrot.slane %v3129_v51, %v3076_v24 }
 0x1db   : > { %v1267_v16 = vadd.f32 %v1251_v4, %v1167_v55  ;;  %v1377_v50 = vrot.slane %v3129_v51, %v3078_v19  ;;  %v1743_v42 = vmul.f32 %v3139_v11, %v1681_v43  ;;  %v1058_v36 = vmul.f32 %v3062_v62, %v993_v31 }
 0x1dc   : > { %v1459_v23 = vadd.f32 %v1443_v49, %v1359_v60  ;;  %v1142_v8 = vmul.f32 %v3064_v63, %v1077_v33  ;;  %v1751_v27 = vmul.f32 %v3139_v11, %v1713_v32  ;;  %v1242_v53 = vmul.f32 %v3066_v57, %v1177_v12  ;;  %v3180_v49 = vpop.permute.xlu0 %1639 }
 0x1dd   : > { %v1367_v15 = vadd.f32 %v1351_v59, %v1267_v16  ;;  %v1477_v61 = vrot.slane %v3129_v51, %v3080_v21  ;;  %v1342_v29 = vmul.f32 %v3104_v30, %v1277_v26  ;;  %v1442_v58 = vmul.f32 %v3068_v20, %v1377_v50 }
 0x1de   : > { %v1158_v48 = vadd.f32 %v1142_v8, %v1058_v36  ;;  %v1677_v0 = vrot.slane %v3129_v51, %v3084_v5  ;;  %v1559_v40 = vadd.f32 %v1543_v54, %v1459_v23  ;;  %v1025_v13 = vrot.slane %v3155_v35, %v3070_v34 }
 0x1df   : > { %v1467_v37 = vadd.f32 %v1451_v56, %v1367_v15  ;;  %v1109_v43 = vrot.slane %v3155_v35, %v3072_v14  ;;  %v1577_v3 = vrot.slane %v3129_v51, %v3082_v22  ;;  %v1209_v18 = vrot.slane %v3155_v35, %v3074_v17  ;;  %v3188_v56 = vpop.f32.mrf.mxu0 }
 0x1e0   : > { %v1258_v39 = vadd.f32 %v1242_v53, %v1158_v48  ;;  %v1309_v44 = vrot.slane %v3155_v35, %v3076_v24  ;;  %v1542_v25 = vmul.f32 %v3096_v28, %v1477_v61  ;;  %v1066_v45 = vmul.f32 %v3062_v62, %v1025_v13  ;;  %v3206_v53 = vld [vmem:[#allocation5 + $0x8] sm:$0xff] }
 0x1e1   : > { %v1150_v46 = vmul.f32 %v3064_v63, %v1109_v43  ;;  %v1409_v10 = vrot.slane %v3155_v35, %v3078_v19  ;;  %v1567_v2 = vadd.f32 %v1551_v7, %v1467_v37  ;;  %v1742_v38 = vmul.f32 %v3139_v11, %v1677_v0 }
 0x1e2   : > { %v1358_v41 = vadd.f32 %v1342_v29, %v1258_v39  ;;  %v1509_v6 = vrot.slane %v3155_v35, %v3080_v21  ;;  %v1250_v4 = vmul.f32 %v3066_v57, %v1209_v18  ;;  %v1350_v55 = vmul.f32 %v3104_v30, %v1309_v44 }
 0x1e3   : > { %v1166_v54 = vadd.f32 %v1150_v46, %v1066_v45  ;;  %v1450_v59 = vmul.f32 %v3068_v20, %v1409_v10  ;;  %v1609_v60 = vrot.slane %v3155_v35, %v3082_v22  ;;  %v1709_v31 = vrot.slane %v3155_v35, %v3084_v5  ;;  %v3222_v10 = vpop.f32.mrf.mxu1 }
 0x1e4   : > { %v1458_v32 = vadd.f32 %v1442_v58, %v1358_v41  ;;  %v1643_v33 = vmul.f32 %v3180_v49, %v1581_v1  ;;  %v1550_v16 = vmul.f32 %v3096_v28, %v1509_v6  ;;  %v1642_v7 = vmul.f32 %v3180_v49, %v1577_v3 }
 0x1e5   : > { %v1266_v12 = vadd.f32 %v1250_v4, %v1166_v54  ;;  %v1651_v26 = vmul.f32 %v3180_v49, %v1613_v9  ;;  %v1005_v36 = vrot.slane %v3188_v56, %v3070_v34  ;;  %v1089_v8 = vrot.slane %v3188_v56, %v3072_v14 }
 0x1e6   : > { %v1558_v50 = vadd.f32 %v1542_v25, %v1458_v32  ;;  %v1659_v23 = vadd.f32 %v1643_v33, %v1559_v40  ;;  %v1189_v61 = vrot.slane %v3188_v56, %v3074_v17  ;;  %v1289_v48 = vrot.slane %v3188_v56, %v3076_v24 }
 0x1e7   : > { %v1366_v15 = vadd.f32 %v1350_v55, %v1266_v12  ;;  %v1667_v1 = vadd.f32 %v1651_v26, %v1567_v2  ;;  %v1061_v58 = vmul.f32 %v3062_v62, %v1005_v36  ;;  %v1145_v0 = vmul.f32 %v3064_v63, %v1089_v8  ;;  %v3259_v26 = vpop.f32.mrf.mxu0 }
 0x1e8   : > { %v1658_v9 = vadd.f32 %v1642_v7, %v1558_v50  ;;  %v1759_v29 = vadd.f32 %v1743_v42, %v1659_v23  ;;  %v1750_v37 = vmul.f32 %v3139_v11, %v1709_v31  ;;  %v1245_v43 = vmul.f32 %v3066_v57, %v1189_v61 }
 0x1e9   : > { %v1466_v40 = vadd.f32 %v1450_v59, %v1366_v15  ;;  %v1767_v13 = vadd.f32 %v1751_v27, %v1667_v1  ;;  %v1161_v18 = vadd.f32 %v1145_v0, %v1061_v58  ;;  %v1389_v44 = vrot.slane %v3188_v56, %v3078_v19 }
 0x1ea   : > { %v1758_v39 = vadd.f32 %v1742_v38, %v1658_v9  ;;  %v1776_v3 = vadd.f32 %v3206_v53, %v1759_v29  ;;  %v1650_v42 = vmul.f32 %v3180_v49, %v1609_v60  ;;  %v1345_v46 = vmul.f32 %v3104_v30, %v1289_v48 }
 0x1eb   : > { %v1566_v25 = vadd.f32 %v1550_v16, %v1466_v40  ;;  %v1784_v45 = vadd.f32 %v3206_v53, %v1767_v13  ;;  %v1261_v41 = vadd.f32 %v1245_v43, %v1161_v18  ;;  %v1489_v38 = vrot.slane %v3188_v56, %v3080_v21 }
 0x1ec   : > { %v1775_v27 = vadd.f32 %v3206_v53, %v1758_v39  ;;  %1792 = vst [vmem:[%s3227_s23 + $0x8] sm:$0xff] %v1776_v3  ;;  %v1808_v2 = vadd.f32 %v3086_v47, %v1776_v3  ;;  %v1445_v4 = vmul.f32 %v3068_v20, %v1389_v44  ;;  %v1589_v55 = vrot.slane %v3188_v56, %v3082_v22 }
 0x1ed   : > { %v1666_v6 = vadd.f32 %v1650_v42, %v1566_v25  ;;  %1800 = vst [vmem:[%s3227_s23 + $0x48] sm:$0xff] %v1784_v45  ;;  %v1816_v54 = vadd.f32 %v3102_v52, %v1784_v45  ;;  %v1361_v47 = vadd.f32 %v1345_v46, %v1261_v41  ;;  %v1689_v32 = vrot.slane %v3188_v56, %v3084_v5 }
 0x1ee   : > { %1791 = vst [vmem:[%s3227_s23] sm:$0xff] %v1775_v27  ;;  %v1807_v59 = vadd.f32 %v1775_v27, %v3129_v51  ;;  %1824 = vst [vmem:[%s3242_s29 + $0x8] sm:$0xff] %v1808_v2  ;;  %v1037_v52 = vrot.slane %v3222_v10, %v3070_v34  ;;  %v1121_v51 = vrot.slane %v3222_v10, %v3072_v14  ;;  %v3291_v27 = vpop.f32.mrf.mxu1 }
 0x1ef   : > { %v1766_v60 = vadd.f32 %v1750_v37, %v1666_v6  ;;  %1832 = vst [vmem:[%s3242_s29 + $0x48] sm:$0xff] %v1816_v54  ;;  %v1221_v31 = vrot.slane %v3222_v10, %v3074_v17  ;;  %v1461_v33 = vadd.f32 %v1445_v4, %v1361_v47  ;;  %v1545_v12 = vmul.f32 %v3096_v28, %v1489_v38 }
 0x1f0   : > { %1823 = vst [vmem:[%s3242_s29] sm:$0xff] %v1807_v59  ;;  %v1069_v16 = vmul.f32 %v3062_v62, %v1037_v52  ;;  %v1321_v7 = vrot.slane %v3222_v10, %v3076_v24  ;;  %v1153_v23 = vmul.f32 %v3064_v63, %v1121_v51  ;;  %v1645_v8 = vmul.f32 %v3180_v49, %v1589_v55 }
 0x1f1   : > { %v1783_v50 = vadd.f32 %v3206_v53, %v1766_v60  ;;  %v1561_v36 = vadd.f32 %v1545_v12, %v1461_v33  ;;  %v1745_v15 = vmul.f32 %v3139_v11, %v1689_v32  ;;  %v1421_v1 = vrot.slane %v3222_v10, %v3078_v19 }
 0x1f2   : > { %v1169_v48 = vadd.f32 %v1153_v23, %v1069_v16  ;;  %v1253_v9 = vmul.f32 %v3066_v57, %v1221_v31  ;;  %v1001_v29 = vrot.slane %v3259_v26, %v3070_v34  ;;  %v1353_v0 = vmul.f32 %v3104_v30, %v1321_v7 }
 0x1f3   : > { %1799 = vst [vmem:[%s3227_s23 + $0x40] sm:$0xff] %v1783_v50  ;;  %v1815_v61 = vadd.f32 %v1783_v50, %v3155_v35  ;;  %v1661_v58 = vadd.f32 %v1645_v8, %v1561_v36  ;;  %v1521_v40 = vrot.slane %v3222_v10, %v3080_v21  ;;  %v1085_v37 = vrot.slane %v3259_v26, %v3072_v14 }
 0x1f4   : > { %v1269_v13 = vadd.f32 %v1253_v9, %v1169_v48  ;;  %v1621_v35 = vrot.slane %v3222_v10, %v3082_v22  ;;  %v1060_v43 = vmul.f32 %v3062_v62, %v1001_v29  ;;  %v1185_v39 = vrot.slane %v3259_v26, %v3074_v17 }
 0x1f5   : > { %1831 = vst [vmem:[%s3242_s29 + $0x40] sm:$0xff] %v1815_v61  ;;  %v1761_v3 = vadd.f32 %v1745_v15, %v1661_v58  ;;  %v1144_v18 = vmul.f32 %v3064_v63, %v1085_v37  ;;  %v1285_v44 = vrot.slane %v3259_v26, %v3076_v24  ;;  %v1453_v42 = vmul.f32 %v3068_v20, %v1421_v1 }
 0x1f6   : > { %v1369_v25 = vadd.f32 %v1353_v0, %v1269_v13  ;;  %v1721_v45 = vrot.slane %v3222_v10, %v3084_v5  ;;  %v1385_v46 = vrot.slane %v3259_v26, %v3078_v19  ;;  %v1553_v41 = vmul.f32 %v3096_v28, %v1521_v40 }
 0x1f7   : > { %v1778_v2 = vadd.f32 %v3206_v53, %v1761_v3  ;;  %v1160_v38 = vadd.f32 %v1144_v18, %v1060_v43  ;;  %v1244_v6 = vmul.f32 %v3066_v57, %v1185_v39  ;;  %v1653_v4 = vmul.f32 %v3180_v49, %v1621_v35 }
 0x1f8   : > { %v1469_v54 = vadd.f32 %v1453_v42, %v1369_v25  ;;  %v1344_v55 = vmul.f32 %v3104_v30, %v1285_v44  ;;  %v1485_v59 = vrot.slane %v3259_v26, %v3080_v21  ;;  %v1033_v52 = vrot.slane %v3291_v27, %v3070_v34 }
 0x1f9   : > { %1794 = vst [vmem:[%s3227_s23 + $0x18] sm:$0xff] %v1778_v2  ;;  %v1810_v47 = vadd.f32 %v3188_v56, %v1778_v2  ;;  %v1260_v32 = vadd.f32 %v1244_v6, %v1160_v38  ;;  %v1117_v60 = vrot.slane %v3291_v27, %v3072_v14  ;;  %v1444_v31 = vmul.f32 %v3068_v20, %v1385_v46 }
 0x1fa   : > { %v1569_v51 = vadd.f32 %v1553_v41, %v1469_v54  ;;  %v1585_v33 = vrot.slane %v3259_v26, %v3082_v22  ;;  %v1217_v12 = vrot.slane %v3291_v27, %v3074_v17  ;;  %v1068_v56 = vmul.f32 %v3062_v62, %v1033_v52 }
 0x1fb   : > { %1826 = vst [vmem:[%s3242_s29 + $0x18] sm:$0xff] %v1810_v47  ;;  %v1360_v16 = vadd.f32 %v1344_v55, %v1260_v32  ;;  %v1152_v7 = vmul.f32 %v3064_v63, %v1117_v60  ;;  %v1317_v50 = vrot.slane %v3291_v27, %v3076_v24  ;;  %v1753_v36 = vmul.f32 %v3139_v11, %v1721_v45 }
 0x1fc   : > { %v1669_v23 = vadd.f32 %v1653_v4, %v1569_v51  ;;  %v1544_v8 = vmul.f32 %v3096_v28, %v1485_v59  ;;  %v1685_v15 = vrot.slane %v3259_v26, %v3084_v5  ;;  %v1252_v48 = vmul.f32 %v3066_v57, %v1217_v12 }
 0x1fd   : > { %v1460_v1 = vadd.f32 %v1444_v31, %v1360_v16  ;;  %v1168_v61 = vadd.f32 %v1152_v7, %v1068_v56  ;;  %v1417_v9 = vrot.slane %v3291_v27, %v3078_v19  ;;  %v1644_v58 = vmul.f32 %v3180_v49, %v1585_v33 }
 0x1fe   : > { %v1769_v29 = vadd.f32 %v1753_v36, %v1669_v23  ;;  %v1352_v37 = vmul.f32 %v3104_v30, %v1317_v50  ;;  %v1517_v13 = vrot.slane %v3291_v27, %v3080_v21  ;;  %v1744_v43 = vmul.f32 %v3139_v11, %v1685_v15 }
 0x1ff   : > { %v1560_v0 = vadd.f32 %v1544_v8, %v1460_v1  ;;  %v1268_v40 = vadd.f32 %v1252_v48, %v1168_v61  ;;  %v1452_v18 = vmul.f32 %v3068_v20, %v1417_v9  ;;  %v1617_v44 = vrot.slane %v3291_v27, %v3082_v22 }
 0x200   : > { %v1786_v35 = vadd.f32 %v3206_v53, %v1769_v29  ;;  %v1552_v46 = vmul.f32 %v3096_v28, %v1517_v13  ;;  %v1717_v2 = vrot.slane %v3291_v27, %v3084_v5 }
 0x201   : > { %v1660_v39 = vadd.f32 %v1644_v58, %v1560_v0  ;;  %v1368_v3 = vadd.f32 %v1352_v37, %v1268_v40  ;;  %v1652_v6 = vmul.f32 %v3180_v49, %v1617_v44 }
 0x202   : > { %1802 = vst [vmem:[%s3227_s23 + $0x58] sm:$0xff] %v1786_v35  ;;  %v1818_v25 = vadd.f32 %v3222_v10, %v1786_v35  ;;  %v1752_v32 = vmul.f32 %v3139_v11, %v1717_v2 }
 0x203   : > { %v1760_v42 = vadd.f32 %v1744_v43, %v1660_v39  ;;  %v1468_v45 = vadd.f32 %v1452_v18, %v1368_v3 }
 0x204   : > { %1834 = vst [vmem:[%s3242_s29 + $0x58] sm:$0xff] %v1818_v25 }
 0x205   : > { %v1777_v41 = vadd.f32 %v3206_v53, %v1760_v42  ;;  %v1568_v38 = vadd.f32 %v1552_v46, %v1468_v45  ;;  %v3340_v54 = vpop.f32.mrf.mxu0 }
 0x206   : > { %v1013_v4 = vrot.slane %v3340_v54, %v3070_v34  ;;  %v1097_v10 = vrot.slane %v3340_v54, %v3072_v14  ;;  %v1197_v55 = vrot.slane %v3340_v54, %v3074_v17  ;;  %v1297_v52 = vrot.slane %v3340_v54, %v3076_v24 }
 0x207   : > { %1793 = vst [vmem:[%s3227_s23 + $0x10] sm:$0xff] %v1777_v41  ;;  %v1809_v59 = vadd.f32 %v1777_v41, %v3259_v26  ;;  %v1668_v47 = vadd.f32 %v1652_v6, %v1568_v38  ;;  %v1397_v31 = vrot.slane %v3340_v54, %v3078_v19  ;;  %v1497_v26 = vrot.slane %v3340_v54, %v3080_v21  ;;  %v3380_v0 = vpop.f32.mrf.mxu0 }
 0x208   : > { %v1063_v60 = vmul.f32 %v3062_v62, %v1013_v4  ;;  %v1147_v51 = vmul.f32 %v3064_v63, %v1097_v10  ;;  %v1247_v12 = vmul.f32 %v3066_v57, %v1197_v55  ;;  %v1597_v16 = vrot.slane %v3340_v54, %v3082_v22  ;;  %v3363_v56 = vpop.f32.mrf.mxu1 }
 0x209   : > { %1825 = vst [vmem:[%s3242_s29 + $0x10] sm:$0xff] %v1809_v59  ;;  %v1768_v33 = vadd.f32 %v1752_v32, %v1668_v47  ;;  %v1697_v50 = vrot.slane %v3340_v54, %v3084_v5  ;;  %v1045_v23 = vrot.slane %v3363_v56, %v3070_v34  ;;  %v1129_v36 = vrot.slane %v3363_v56, %v3072_v14 }
 0x20a   : > { %v1163_v7 = vadd.f32 %v1147_v51, %v1063_v60  ;;  %v1347_v15 = vmul.f32 %v3104_v30, %v1297_v52  ;;  %v1229_v1 = vrot.slane %v3363_v56, %v3074_v17  ;;  %v1329_v61 = vrot.slane %v3363_v56, %v3076_v24 }
 0x20b   : > { %v1785_v8 = vadd.f32 %v3206_v53, %v1768_v33  ;;  %v1447_v9 = vmul.f32 %v3068_v20, %v1397_v31  ;;  %v1071_v29 = vmul.f32 %v3062_v62, %v1045_v23  ;;  %v1155_v58 = vmul.f32 %v3064_v63, %v1129_v36  ;;  %v3415_v33 = vpop.f32.mrf.mxu1 }
 0x20c   : > { %v1263_v48 = vadd.f32 %v1247_v12, %v1163_v7  ;;  %v1547_v37 = vmul.f32 %v3096_v28, %v1497_v26  ;;  %v1647_v13 = vmul.f32 %v3180_v49, %v1597_v16  ;;  %v1429_v35 = vrot.slane %v3363_v56, %v3078_v19 }
 0x20d   : > { %1801 = vst [vmem:[%s3227_s23 + $0x50] sm:$0xff] %v1785_v8  ;;  %v1817_v40 = vadd.f32 %v1785_v8, %v3291_v27  ;;  %v1747_v39 = vmul.f32 %v3139_v11, %v1697_v50  ;;  %v1171_v3 = vadd.f32 %v1155_v58, %v1071_v29  ;;  %v1255_v18 = vmul.f32 %v3066_v57, %v1229_v1 }
 0x20e   : > { %v1363_v43 = vadd.f32 %v1347_v15, %v1263_v48  ;;  %v1355_v44 = vmul.f32 %v3104_v30, %v1329_v61  ;;  %v1529_v25 = vrot.slane %v3363_v56, %v3080_v21  ;;  %v1009_v27 = vrot.slane %v3380_v0, %v3070_v34 }
 0x20f   : > { %1833 = vst [vmem:[%s3242_s29 + $0x50] sm:$0xff] %v1817_v40  ;;  %v1093_v42 = vrot.slane %v3380_v0, %v3072_v14  ;;  %v1271_v46 = vadd.f32 %v1255_v18, %v1171_v3  ;;  %v1629_v2 = vrot.slane %v3363_v56, %v3082_v22  ;;  %v1729_v41 = vrot.slane %v3363_v56, %v3084_v5 }
 0x210   : > { %v1463_v45 = vadd.f32 %v1447_v9, %v1363_v43  ;;  %v1455_v38 = vmul.f32 %v3068_v20, %v1429_v35  ;;  %v1062_v6 = vmul.f32 %v3062_v62, %v1009_v27  ;;  %v1193_v10 = vrot.slane %v3380_v0, %v3074_v17 }
 0x211   : > { %v1146_v4 = vmul.f32 %v3064_v63, %v1093_v42  ;;  %v1371_v59 = vadd.f32 %v1355_v44, %v1271_v46  ;;  %v1293_v47 = vrot.slane %v3380_v0, %v3076_v24  ;;  %v1393_v32 = vrot.slane %v3380_v0, %v3078_v19 }
 0x212   : > { %v1563_v55 = vadd.f32 %v1547_v37, %v1463_v45  ;;  %v1555_v52 = vmul.f32 %v3096_v28, %v1529_v25  ;;  %v1246_v51 = vmul.f32 %v3066_v57, %v1193_v10  ;;  %v1493_v31 = vrot.slane %v3380_v0, %v3080_v21  ;;  %v3440_v25 = vpop.f32.mrf.mxu0 }
 0x213   : > { %v1162_v60 = vadd.f32 %v1146_v4, %v1062_v6  ;;  %v1471_v26 = vadd.f32 %v1455_v38, %v1371_v59  ;;  %v1655_v16 = vmul.f32 %v3180_v49, %v1629_v2  ;;  %v1755_v7 = vmul.f32 %v3139_v11, %v1729_v41 }
 0x214   : > { %v1663_v12 = vadd.f32 %v1647_v13, %v1563_v55  ;;  %v1346_v23 = vmul.f32 %v3104_v30, %v1293_v47  ;;  %v1446_v36 = vmul.f32 %v3068_v20, %v1393_v32  ;;  %v1593_v8 = vrot.slane %v3380_v0, %v3082_v22 }
 0x215   : > { %v1262_v50 = vadd.f32 %v1246_v51, %v1162_v60  ;;  %v1571_v1 = vadd.f32 %v1555_v52, %v1471_v26  ;;  %v1041_v61 = vrot.slane %v3415_v33, %v3070_v34  ;;  %v1125_v48 = vrot.slane %v3415_v33, %v3072_v14 }
 0x216   : > { %v1763_v15 = vadd.f32 %v1747_v39, %v1663_v12  ;;  %v1546_v29 = vmul.f32 %v3096_v28, %v1493_v31  ;;  %v1225_v58 = vrot.slane %v3415_v33, %v3074_v17  ;;  %v1325_v40 = vrot.slane %v3415_v33, %v3076_v24 }
 0x217   : > { %v1362_v9 = vadd.f32 %v1346_v23, %v1262_v50  ;;  %v1671_v13 = vadd.f32 %v1655_v16, %v1571_v1  ;;  %v1070_v35 = vmul.f32 %v3062_v62, %v1041_v61  ;;  %v1154_v43 = vmul.f32 %v3064_v63, %v1125_v48 }
 0x218   : > { %v1780_v37 = vadd.f32 %v3206_v53, %v1763_v15  ;;  %v1646_v3 = vmul.f32 %v3180_v49, %v1593_v8  ;;  %v1693_v18 = vrot.slane %v3380_v0, %v3084_v5  ;;  %v1425_v44 = vrot.slane %v3415_v33, %v3078_v19  ;;  %v3474_v15 = vpop.f32.mrf.mxu1 }
 0x219   : > { %v1462_v39 = vadd.f32 %v1446_v36, %v1362_v9  ;;  %v1771_v42 = vadd.f32 %v1755_v7, %v1671_v13  ;;  %v1170_v45 = vadd.f32 %v1154_v43, %v1070_v35  ;;  %v1254_v46 = vmul.f32 %v3066_v57, %v1225_v58 }
 0x21a   : > { %1796 = vst [vmem:[%s3227_s23 + $0x28] sm:$0xff] %v1780_v37  ;;  %v1812_v27 = vadd.f32 %v3340_v54, %v1780_v37  ;;  %v1354_v41 = vmul.f32 %v3104_v30, %v1325_v40  ;;  %v1525_v38 = vrot.slane %v3415_v33, %v3080_v21  ;;  %v1625_v6 = vrot.slane %v3415_v33, %v3082_v22 }
 0x21b   : > { %v1562_v2 = vadd.f32 %v1546_v29, %v1462_v39  ;;  %v1788_v4 = vadd.f32 %v3206_v53, %v1771_v42  ;;  %v1270_v10 = vadd.f32 %v1254_v46, %v1170_v45  ;;  %v1725_v54 = vrot.slane %v3415_v33, %v3084_v5 }
 0x21c   : > { %1828 = vst [vmem:[%s3242_s29 + $0x28] sm:$0xff] %v1812_v27  ;;  %v1021_v55 = vrot.slane %v3440_v25, %v3070_v34  ;;  %v1746_v47 = vmul.f32 %v3139_v11, %v1693_v18  ;;  %v1454_v32 = vmul.f32 %v3068_v20, %v1425_v44  ;;  %v1105_v52 = vrot.slane %v3440_v25, %v3072_v14 }
 0x21d   : > { %v1662_v59 = vadd.f32 %v1646_v3, %v1562_v2  ;;  %1804 = vst [vmem:[%s3227_s23 + $0x68] sm:$0xff] %v1788_v4  ;;  %v1820_v60 = vadd.f32 %v3363_v56, %v1788_v4  ;;  %v1370_v51 = vadd.f32 %v1354_v41, %v1270_v10  ;;  %v1205_v12 = vrot.slane %v3440_v25, %v3074_v17  ;;  %v3501_v2 = vpop.f32.mrf.mxu0 }
 0x21e   : > { %v1065_v31 = vmul.f32 %v3062_v62, %v1021_v55  ;;  %v1554_v16 = vmul.f32 %v3096_v28, %v1525_v38  ;;  %v1149_v7 = vmul.f32 %v3064_v63, %v1105_v52  ;;  %v1305_v50 = vrot.slane %v3440_v25, %v3076_v24 }
 0x21f   : > { %v1762_v26 = vadd.f32 %v1746_v47, %v1662_v59  ;;  %1836 = vst [vmem:[%s3242_s29 + $0x68] sm:$0xff] %v1820_v60  ;;  %v1470_v23 = vadd.f32 %v1454_v32, %v1370_v51  ;;  %v1654_v36 = vmul.f32 %v3180_v49, %v1625_v6  ;;  %v1754_v56 = vmul.f32 %v3139_v11, %v1725_v54 }
 0x220   : > { %v1405_v8 = vrot.slane %v3440_v25, %v3078_v19  ;;  %v1165_v61 = vadd.f32 %v1149_v7, %v1065_v31  ;;  %v1249_v48 = vmul.f32 %v3066_v57, %v1205_v12  ;;  %v1505_v9 = vrot.slane %v3440_v25, %v3080_v21 }
 0x221   : > { %v1779_v1 = vadd.f32 %v3206_v53, %v1762_v26  ;;  %v1570_v29 = vadd.f32 %v1554_v16, %v1470_v23  ;;  %v1349_v58 = vmul.f32 %v3104_v30, %v1305_v50  ;;  %v1605_v40 = vrot.slane %v3440_v25, %v3082_v22 }
 0x222   : > { %v1705_v37 = vrot.slane %v3440_v25, %v3084_v5  ;;  %v1265_v35 = vadd.f32 %v1249_v48, %v1165_v61  ;;  %v1053_v43 = vrot.slane %v3474_v15, %v3070_v34  ;;  %v1137_v39 = vrot.slane %v3474_v15, %v3072_v14  ;;  %v3532_v48 = vpop.f32.mrf.mxu1 }
 0x223   : > { %1795 = vst [vmem:[%s3227_s23 + $0x20] sm:$0xff] %v1779_v1  ;;  %v1811_v13 = vadd.f32 %v1779_v1, %v3380_v0  ;;  %v1670_v3 = vadd.f32 %v1654_v36, %v1570_v29  ;;  %v1449_v18 = vmul.f32 %v3068_v20, %v1405_v8  ;;  %v1237_v44 = vrot.slane %v3474_v15, %v3074_v17 }
 0x224   : > { %v1337_v27 = vrot.slane %v3474_v15, %v3076_v24  ;;  %v1365_v42 = vadd.f32 %v1349_v58, %v1265_v35  ;;  %v1073_v0 = vmul.f32 %v3062_v62, %v1053_v43  ;;  %v1157_v45 = vmul.f32 %v3064_v63, %v1137_v39 }
 0x225   : > { %1827 = vst [vmem:[%s3242_s29 + $0x20] sm:$0xff] %v1811_v13  ;;  %v1437_v46 = vrot.slane %v3474_v15, %v3078_v19  ;;  %v1770_v41 = vadd.f32 %v1754_v56, %v1670_v3  ;;  %v1549_v38 = vmul.f32 %v3096_v28, %v1505_v9  ;;  %v1649_v6 = vmul.f32 %v3180_v49, %v1605_v40 }
 0x226   : > { %v1749_v4 = vmul.f32 %v3139_v11, %v1705_v37  ;;  %v1465_v10 = vadd.f32 %v1449_v18, %v1365_v42  ;;  %v1173_v54 = vadd.f32 %v1157_v45, %v1073_v0  ;;  %v1257_v55 = vmul.f32 %v3066_v57, %v1237_v44 }
 0x227   : > { %v1357_v59 = vmul.f32 %v3104_v30, %v1337_v27  ;;  %v1787_v47 = vadd.f32 %v3206_v53, %v1770_v41  ;;  %v1457_v32 = vmul.f32 %v3068_v20, %v1437_v46  ;;  %v1537_v52 = vrot.slane %v3474_v15, %v3080_v21 }
 0x228   : > { %v1017_v60 = vrot.slane %v3501_v2, %v3070_v34  ;;  %v1565_v51 = vadd.f32 %v1549_v38, %v1465_v10  ;;  %v1273_v31 = vadd.f32 %v1257_v55, %v1173_v54  ;;  %v1637_v12 = vrot.slane %v3474_v15, %v3082_v22 }
 0x229   : > { %v1101_v26 = vrot.slane %v3501_v2, %v3072_v14  ;;  %1803 = vst [vmem:[%s3227_s23 + $0x60] sm:$0xff] %v1787_v47  ;;  %v1819_v16 = vadd.f32 %v1787_v47, %v3415_v33  ;;  %v1737_v7 = vrot.slane %v3474_v15, %v3084_v5  ;;  %v1201_v23 = vrot.slane %v3501_v2, %v3074_v17 }
 0x22a   : > { %v1064_v50 = vmul.f32 %v3062_v62, %v1017_v60  ;;  %v1665_v36 = vadd.f32 %v1649_v6, %v1565_v51  ;;  %v1373_v56 = vadd.f32 %v1357_v59, %v1273_v31  ;;  %v1301_v1 = vrot.slane %v3501_v2, %v3076_v24 }
 0x22b   : > { %v1148_v8 = vmul.f32 %v3064_v63, %v1101_v26  ;;  %1835 = vst [vmem:[%s3242_s29 + $0x60] sm:$0xff] %v1819_v16  ;;  %v1557_v61 = vmul.f32 %v3096_v28, %v1537_v52  ;;  %v1401_v33 = vrot.slane %v3501_v2, %v3078_v19  ;;  %v1248_v40 = vmul.f32 %v3066_v57, %v1201_v23 }
 0x22c   : > { %v1765_v9 = vadd.f32 %v1749_v4, %v1665_v36  ;;  %v1473_v29 = vadd.f32 %v1457_v32, %v1373_v56  ;;  %v1657_v37 = vmul.f32 %v3180_v49, %v1637_v12  ;;  %v1757_v13 = vmul.f32 %v3139_v11, %v1737_v7 }
 0x22d   : > { %v1164_v58 = vadd.f32 %v1148_v8, %v1064_v50  ;;  %v1348_v35 = vmul.f32 %v3104_v30, %v1301_v1  ;;  %v1501_v43 = vrot.slane %v3501_v2, %v3080_v21  ;;  %v1049_v44 = vrot.slane %v3532_v48, %v3070_v34 }
 0x22e   : > { %v1782_v39 = vadd.f32 %v3206_v53, %v1765_v9  ;;  %v1573_v3 = vadd.f32 %v1557_v61, %v1473_v29  ;;  %v1448_v27 = vmul.f32 %v3068_v20, %v1401_v33  ;;  %v1601_v42 = vrot.slane %v3501_v2, %v3082_v22 }
 0x22f   : > { %v1264_v18 = vadd.f32 %v1248_v40, %v1164_v58  ;;  %v1133_v0 = vrot.slane %v3532_v48, %v3072_v14  ;;  %v1233_v45 = vrot.slane %v3532_v48, %v3074_v17  ;;  %v1072_v6 = vmul.f32 %v3062_v62, %v1049_v44 }
 0x230   : > { %1798 = vst [vmem:[%s3227_s23 + $0x38] sm:$0xff] %v1782_v39  ;;  %v1814_v46 = vadd.f32 %v3440_v25, %v1782_v39  ;;  %v1673_v41 = vadd.f32 %v1657_v37, %v1573_v3  ;;  %v1333_v4 = vrot.slane %v3532_v48, %v3076_v24  ;;  %v1548_v14 = vmul.f32 %v3096_v28, %v1501_v43 }
 0x231   : > { %v1364_v38 = vadd.f32 %v1348_v35, %v1264_v18  ;;  %v1156_v34 = vmul.f32 %v3064_v63, %v1133_v0  ;;  %v1701_v17 = vrot.slane %v3501_v2, %v3084_v5  ;;  %v1256_v25 = vmul.f32 %v3066_v57, %v1233_v45 }
 0x232   : > { %1830 = vst [vmem:[%s3242_s29 + $0x38] sm:$0xff] %v1814_v46  ;;  %v1773_v10 = vadd.f32 %v1757_v13, %v1673_v41  ;;  %v1433_v62 = vrot.slane %v3532_v48, %v3078_v19  ;;  %v1648_v24 = vmul.f32 %v3180_v49, %v1601_v42  ;;  %v1356_v32 = vmul.f32 %v3104_v30, %v1333_v4 }
 0x233   : > { %v1464_v54 = vadd.f32 %v1448_v27, %v1364_v38  ;;  %v1172_v55 = vadd.f32 %v1156_v34, %v1072_v6  ;;  %v1533_v52 = vrot.slane %v3532_v48, %v3080_v21  ;;  %v1748_v57 = vmul.f32 %v3139_v11, %v1701_v17 }
 0x234   : > { %v1790_v63 = vadd.f32 %v3206_v53, %v1773_v10  ;;  %v1456_v31 = vmul.f32 %v3068_v20, %v1433_v62  ;;  %v1633_v12 = vrot.slane %v3532_v48, %v3082_v22 }
 0x235   : > { %v1564_v59 = vadd.f32 %v1548_v14, %v1464_v54  ;;  %v1272_v47 = vadd.f32 %v1256_v25, %v1172_v55  ;;  %v1556_v26 = vmul.f32 %v3096_v28, %v1533_v52 }
 0x236   : > { %1806 = vst [vmem:[%s3227_s23 + $0x78] sm:$0xff] %v1790_v63  ;;  %v1822_v60 = vadd.f32 %v3474_v15, %v1790_v63  ;;  %v1733_v15 = vrot.slane %v3532_v48, %v3084_v5  ;;  %v1656_v50 = vmul.f32 %v3180_v49, %v1633_v12 }
 0x237   : > { %v1664_v51 = vadd.f32 %v1648_v24, %v1564_v59  ;;  %v1372_v19 = vadd.f32 %v1356_v32, %v1272_v47 }
 0x238   : > { %1838 = vst [vmem:[%s3242_s29 + $0x78] sm:$0xff] %v1822_v60  ;;  %v1756_v23 = vmul.f32 %v3139_v11, %v1733_v15 }
 0x239   : > { %v1764_v30 = vadd.f32 %v1748_v57, %v1664_v51  ;;  %v1472_v21 = vadd.f32 %v1456_v31, %v1372_v19 }
 0x23b   : > { %v1781_v16 = vadd.f32 %v3206_v53, %v1764_v30  ;;  %v1572_v7 = vadd.f32 %v1556_v26, %v1472_v21 }
 0x23d   : > { %1797 = vst [vmem:[%s3227_s23 + $0x30] sm:$0xff] %v1781_v16  ;;  %v1813_v20 = vadd.f32 %v1781_v16, %v3501_v2  ;;  %v1672_v22 = vadd.f32 %v1656_v50, %v1572_v7 }
 0x23f   : > { %1829 = vst [vmem:[%s3242_s29 + $0x30] sm:$0xff] %v1813_v20  ;;  %v1772_v28 = vadd.f32 %v1756_v23, %v1672_v22 }
 0x241   : > { %v1789_v5 = vadd.f32 %v3206_v53, %v1772_v28 }
 0x243   : > { %1805 = vst [vmem:[%s3227_s23 + $0x70] sm:$0xff] %v1789_v5  ;;  %v1821_v11 = vadd.f32 %v1789_v5, %v3532_v48 }
 0x244   : > { %2417 = shalt.err (!%p2414_p9)
}
 0x245   : > { %s2418_s21 = scalar_lea.hbm %s3591_s26, 2048  ;;  %s2422_s25 = scalar_lea.hbm %s3677_s4, 4096 }
 0x246   : > { %p2419_p13 = scmp.ne.s32.totalorder %s3591_s26, %s2418_s21  ;;  %p2423_p4 = scmp.lt.s32.totalorder %s3591_s26, %s3677_s4 }
 0x247   : > { %p2424_p8 = scmp.lt.s32.totalorder %s2422_s25, %s2418_s21 }
 0x248   : > { %p2420_p5 = pnand %p2419_p13, %p3693_p10 }
 0x249   : > { %p2425_p3 = por %p2424_p8, %p2423_p4 }
 0x24a   : > { %p2421_p0 = pneg %p2420_p5 }
 0x24c   : > { %p2426_p11 = pnand %p2425_p3, %p2421_p0 }
 0x24e   : > { %2429 = shalt.err (!%p2426_p11)
}
 0x24f   : > { %s2523_s19 = smov 128   ;;  %s2524_s8 = smov 8   ;;  %1837 = vst [vmem:[%s3242_s29 + $0x70] sm:$0xff] %v1821_v11 }
 0x250   : > { %2170 = dma.vmem_to_hbm [thread:$0]  (%p3693_p10), %s3593_s6, 2048, %s3591_s26, %s1845_s30, %s2523_s19, %s2523_s19, %s2524_s8  }
 0x251   : > { %s1840_s10 = scalar_lea.sflag [#allocation4], %s2678_s9  ;;  %s2430_s12 = scalar_lea.vmem %s3602_s7, 2048 }
 0x252   : > { %p2431_p1 = scmp.ne.s32.totalorder %s3602_s7, %s2430_s12  ;;  %s2525_s13 = smov [#allocation8]  }
 0x253   : > { %s2434_s21 = sshll.u32 %s2525_s13, 4  ;;  %s2435_s21 = int_to_ptr.vmem [resolvable:$false] %s2434_s21 }
 0x254   : > { %p2432_p2 = pnand %p2431_p1, %p3693_p10  ;;  %s2436_s23 = scalar_lea.vmem %s2435_s21, 4096 }
 0x255   : > { %p2437_p12 = scmp.lt.s32.totalorder %s3602_s7, %s2435_s21  ;;  %p2438_p7 = scmp.lt.s32.totalorder %s2436_s23, %s2430_s12 }
 0x256   : > { %p2433_p6 = pneg %p2432_p2 }
 0x257   : > { %p2439_p9 = por %p2438_p7, %p2437_p12 }
 0x259   : > { %p2440_p13 = pnand %p2439_p9, %p2433_p6 }
 0x25b   : > { %2443 = shalt.err (!%p2440_p13)
}
 0x25c   : > { %s2444_s29 = scalar_lea.hbm %s3600_s28, 2048  ;;  %s2448_s26 = scalar_lea.hbm %s3676_s3, 4096 }
 0x25d   : > { %p2445_p5 = scmp.ne.s32.totalorder %s3600_s28, %s2444_s29  ;;  %p2449_p8 = scmp.lt.s32.totalorder %s3600_s28, %s3676_s3 }
 0x25e   : > { %p2450_p3 = scmp.lt.s32.totalorder %s2448_s26, %s2444_s29 }
 0x25f   : > { %p2446_p0 = pnand %p2445_p5, %p3693_p10 }
 0x260   : > { %p2451_p11 = por %p2450_p3, %p2449_p8 }
 0x261   : > { %p2447_p4 = pneg %p2446_p0 }
 0x263   : > { %p2452_p1 = pnand %p2451_p11, %p2447_p4 }
 0x265   : > { %2455 = shalt.err (!%p2452_p1)
}
 0x266   : > { %2169 = dma.vmem_to_hbm [thread:$0]  (%p3693_p10), %s3602_s7, 2048, %s3600_s28, %s1840_s10, %s2523_s19, %s2523_s19, %s2524_s8  }
 0x267 PF: > { %s1889_s25 = sand.u32 1, %s2490_s15   ;;  %p3694_p2 = scmp.ne.s32.totalorder %s3683_s22, 0 }
 0x268   : > { %p3695_p6 = scmp.ge.s32.totalorder %s2502_s18, 2  ;;  %s1890_s24 = scalar_lea.sflag [#allocation4], %s1889_s25 }
 0x26a   : > { %p2185_p12 = pnand %p3695_p6, %p3694_p2 }
 0x26c   : > { %p2186_p7 = pneg %p2185_p12 }
 0x26e   : > { %2481 = dma.done.wait (%p2186_p7), %s1890_s24, 2048  }
 0x26f   : > { %2483 = vsyncadd (%p2186_p7), %s1890_s24, 4294965248  ;;  %s1899_s27 = scalar_lea.sflag [#allocation10], %s1889_s25 }
 0x270   : > { %2485 = dma.done.wait (%p2186_p7), %s1899_s27, 2048  }
 0x271   : > { %2487 = vsyncadd (%p2186_p7), %s1899_s27, 4294965248  ;;  %p22_p10 = scmp.ge.s32.totalorder %s2623_s11, 4   ;;  %s3696_s15 = smov %s2494_s16 }
 0x272   : > { %s3697_s16 = smov %s2498_s17  ;;  %s3698_s17 = smov %s2639_s20 }
 0x273   : > { %s3699_s18 = smov %s2623_s11  ;;  %24 = sbr.rel (!%p22_p10) target bundleno = 8 (0x8), region = 102 }
 0x278   :  { %1904 = vsyncpa [#allocation3], 1 }
 0x279   :  { %1906 = vsyncpa [#allocation3 + $0x1], 1 }
 0x27a   :  { %1907 = vsyncpa [#allocation6], 1 }
 0x27b   :  { %1908 = vsyncpa [#allocation4], 1 }
 0x27c   :  { %1910 = vsyncpa [#allocation4 + $0x1], 1 }
 0x27d   :  { %1911 = vsyncpa [#allocation10], 1 }
 0x27e   :  { %1913 = vsyncpa [#allocation10 + $0x1], 1 }

</bundles_post_ra>
